<compile_context>
chip_gen: v7x
topology: tpu7x:2x2x1
jax: 0.10.0
libtpu: 0.0.40
codegen_flags: <defaults>
</compile_context>

<pallas_src>
import jax
import jax.numpy as jnp
from jax.experimental import pallas as pl


def combonn_video_kernel(x_ref, inmask_ref, lens_ref,
                         w0_ref, b0_ref, w1_ref, b1_ref, w2_ref, b2_ref,
                         wih_ref, whh_ref, blstm_ref,
                         wp1_ref, bp1_ref, wp2_ref, bp2_ref,
                         out_ref):
    BB = out_ref.shape[0]            # padded batch (multiple of 8)
    NH = w2_ref.shape[1]             # LSTM hidden size
    LL = x_ref.shape[0] // BB        # sequence length (static)

    # ---- MLP head over all (LL*BB) rows: one batched matmul chain (MXU) ----
    x = x_ref[...]
    h = jnp.maximum(
        jnp.dot(x, w0_ref[...], preferred_element_type=jnp.float32) + b0_ref[...], 0.0)
    h = jnp.maximum(
        jnp.dot(h, w1_ref[...], preferred_element_type=jnp.float32) + b1_ref[...], 0.0)
    z = jnp.dot(h, w2_ref[...], preferred_element_type=jnp.float32) + b2_ref[...]

    # torch.where(mask, lstm_input, 0): row-wise mask, fused before the gates
    # matmul (a per-row scale commutes with the right-multiply by wih).
    zm = z * inmask_ref[...]                                   # (LL*BB, NH)

    # ---- hoisted input projection: gates_x for ALL time steps at once ----
    gates_x = (jnp.dot(zm, wih_ref[...], preferred_element_type=jnp.float32)
               + blstm_ref[...])                               # (LL*BB, 4*NH)

    whh = whh_ref[...]               # (NH, 4*NH), gate order i|f|g|o (PyTorch)
    lens = lens_ref[...]             # (BB, NH) f32: X_lengths broadcast on lanes

    h_t = jnp.zeros((BB, NH), jnp.float32)
    c_t = jnp.zeros((BB, NH), jnp.float32)

    # Fully unrolled recurrence (LL is a compile-time constant): only the
    # h_prev @ whh matmul + gate math is on the serial dependency chain.
    for t in range(LL):
        gx = gates_x[t * BB:(t + 1) * BB, :]                   # static slice, (BB, 4NH)
        gates = gx + jnp.dot(h_t, whh, preferred_element_type=jnp.float32)

        # full-width nonlinearities on the 128-lane gate tile (one vreg each)
        sg = jax.nn.sigmoid(gates)
        th = jnp.tanh(gates)
        i_g = sg[:, 0 * NH:1 * NH]
        f_g = sg[:, 1 * NH:2 * NH]
        g_g = th[:, 2 * NH:3 * NH]
        o_g = sg[:, 3 * NH:4 * NH]

        c_new = f_g * c_t + i_g * g_g
        h_new = o_g * jnp.tanh(c_new)

        # pack_padded_sequence semantics: state frozen once t >= length[b]
        keep = lens > jnp.float32(t)                           # (BB, NH) bool
        h_t = jnp.where(keep, h_new, h_t)
        c_t = jnp.where(keep, c_new, c_t)

    # ---- post_lstm head + sigmoid (wp2/bp2 lane-padded to 128 columns) ----
    p = jnp.maximum(
        jnp.dot(h_t, wp1_ref[...], preferred_element_type=jnp.float32) + bp1_ref[...], 0.0)
    o = jnp.dot(p, wp2_ref[...], preferred_element_type=jnp.float32) + bp2_ref[...]
    out_ref[...] = jax.nn.sigmoid(o)


def combonn_video_forward(inpt, mask, x_lengths, params):
    """inpt: (bb, ll, ft) f32, mask: (bb, ll) bool, x_lengths: (bb,) int32."""
    bb, ll, ft = inpt.shape
    nhid = params["w2"].shape[1]
    out_nch = params["wp2"].shape[1]
    LANE = 128

    # Pad batch to a multiple of 8 for full sublane / MXU-row occupancy.
    # Padded rows get mask=False and length=0 -> they stay at h=0 and are
    # sliced away below, so real outputs are unaffected.
    bbp = max(8, ((bb + 7) // 8) * 8)
    pad = bbp - bb
    inpt_p = jnp.pad(inpt.astype(jnp.float32), ((0, pad), (0, 0), (0, 0)))
    mask_p = jnp.pad(mask, ((0, pad), (0, 0)))
    lens_p = jnp.pad(x_lengths.astype(jnp.int32), ((0, pad),))

    # Time-major flatten: rows [t*bbp : (t+1)*bbp] hold time-step t.
    x2d = jnp.transpose(inpt_p, (1, 0, 2)).reshape(ll * bbp, ft)
    # Lane-dense per-row mask (broadcast over the nhid lane axis).
    inmask2d = jnp.broadcast_to(
        jnp.transpose(mask_p.astype(jnp.float32), (1, 0)).reshape(ll * bbp, 1),
        (ll * bbp, nhid))
    # Lengths as a lane-dense (bbp, nhid) tile; the per-step gate mask is built
    # in-kernel by comparing against the (static) step index.
    lens2d = jnp.broadcast_to(lens_p.astype(jnp.float32)[:, None], (bbp, nhid))

    # Lane-pad the final projection so the output store is a full 128-lane vst.
    wp2_p = jnp.pad(params["wp2"], ((0, 0), (0, LANE - out_nch)))
    bp2_p = jnp.pad(params["bp2"], ((0, 0), (0, LANE - out_nch)))

    out = pl.pallas_call(
        combonn_video_kernel,
        out_shape=jax.ShapeDtypeStruct((bbp, LANE), jnp.float32),
    )(x2d, inmask2d, lens2d,
      params["w0"], params["b0"], params["w1"], params["b1"],
      params["w2"], params["b2"],
      params["wih"], params["whh"], params["blstm"],
      params["wp1"], params["bp1"], wp2_p, bp2_p)

    return out[:bb, :out_nch]


def combonn_video_reference(inpt, mask, x_lengths, params):
    """Pure-JAX reference of the PyTorch forward (for correctness check)."""
    bb, ll, ft = inpt.shape
    nhid = params["w2"].shape[1]

    x = inpt.reshape(bb * ll, ft).astype(jnp.float32)
    h = jax.nn.relu(x @ params["w0"] + params["b0"])
    h = jax.nn.relu(h @ params["w1"] + params["b1"])
    z = (h @ params["w2"] + params["b2"]).reshape(bb, ll, nhid)
    z = jnp.where(mask[:, :, None], z, 0.0)

    def step(carry, t):
        h_t, c_t = carry
        x_t = z[:, t, :]
        gates = x_t @ params["wih"] + h_t @ params["whh"] + params["blstm"]
        i_g = jax.nn.sigmoid(gates[:, 0 * nhid:1 * nhid])
        f_g = jax.nn.sigmoid(gates[:, 1 * nhid:2 * nhid])
        g_g = jnp.tanh(gates[:, 2 * nhid:3 * nhid])
        o_g = jax.nn.sigmoid(gates[:, 3 * nhid:4 * nhid])
        c_new = f_g * c_t + i_g * g_g
        h_new = o_g * jnp.tanh(c_new)
        keep = (x_lengths > t)[:, None]
        return (jnp.where(keep, h_new, h_t), jnp.where(keep, c_new, c_t)), None

    init = (jnp.zeros((bb, nhid), jnp.float32), jnp.zeros((bb, nhid), jnp.float32))
    (h_n, _), _ = jax.lax.scan(step, init, jnp.arange(ll))

    p = jax.nn.relu(h_n @ params["wp1"] + params["bp1"])
    return jax.nn.sigmoid(p @ params["wp2"] + params["bp2"])


def init_params(key, in_nch=18, hlweights=(32, 32), nhid=32, out_nch=3):
    """Deterministic PyTorch-style uniform(-1/sqrt(fan_in), 1/sqrt(fan_in)) init."""
    ks = jax.random.split(key, 16)

    def uni(k, shape, fan_in):
        b = 1.0 / jnp.sqrt(jnp.float32(fan_in))
        return jax.random.uniform(k, shape, jnp.float32, -b, b)

    h0, h1 = int(hlweights[0]), int(hlweights[1])
    params = {
        # MLP (weights stored (in, out) for x @ W)
        "w0": uni(ks[0], (in_nch, h0), in_nch), "b0": uni(ks[1], (1, h0), in_nch),
        "w1": uni(ks[2], (h0, h1), h0),         "b1": uni(ks[3], (1, h1), h0),
        "w2": uni(ks[4], (h1, nhid), h1),       "b2": uni(ks[5], (1, nhid), h1),
        # LSTM (PyTorch gate order i|f|g|o along the 4*nhid axis);
        # blstm emulates bias_ih + bias_hh summed into one vector.
        "wih": uni(ks[6], (nhid, 4 * nhid), nhid),
        "whh": uni(ks[7], (nhid, 4 * nhid), nhid),
        "blstm": uni(ks[8], (1, 4 * nhid), nhid) + uni(ks[9], (1, 4 * nhid), nhid),
        # post_lstm
        "wp1": uni(ks[10], (nhid, nhid), nhid),    "bp1": uni(ks[11], (1, nhid), nhid),
        "wp2": uni(ks[12], (nhid, out_nch), nhid), "bp2": uni(ks[13], (1, out_nch), nhid),
    }
    return params


if __name__ == "__main__":
    key = jax.random.PRNGKey(0)
    k_param, k_inpt = jax.random.split(key)

    in_nch, hlweights, nhid, out_nch = 18, (32, 32), 32, 3   # hlnum=3, lstm_nch=32
    bb, ll = 2, 8

    params = init_params(k_param, in_nch, hlweights, nhid, out_nch)

    inpt = jax.random.normal(k_inpt, (bb, ll, in_nch), dtype=jnp.float32)
    x_lengths = jnp.array([8, 5], dtype=jnp.int32)
    mask = jnp.arange(ll, dtype=jnp.int32)[None, :] < x_lengths[:, None]   # (bb, ll) bool

    out = combonn_video_forward(inpt, mask, x_lengths, params)
    out = jax.block_until_ready(out)
    assert out.shape == (bb, out_nch)

    ref = jax.block_until_ready(combonn_video_reference(inpt, mask, x_lengths, params))
    assert jnp.allclose(out, ref, atol=1e-3, rtol=1e-3), "kernel/reference mismatch"

    print("KERNEL_OK")
</pallas_src>

<mosaic_0001>
module attributes {stable_mosaic.version = 11 : i64} {
  func.func @combonn_video_kernel(%arg0: memref<64x18xf32, #tpu.memory_space<vmem>>, %arg1: memref<64x32xf32, #tpu.memory_space<vmem>>, %arg2: memref<8x32xf32, #tpu.memory_space<vmem>>, %arg3: memref<18x32xf32, #tpu.memory_space<vmem>>, %arg4: memref<1x32xf32, #tpu.memory_space<vmem>>, %arg5: memref<32x32xf32, #tpu.memory_space<vmem>>, %arg6: memref<1x32xf32, #tpu.memory_space<vmem>>, %arg7: memref<32x32xf32, #tpu.memory_space<vmem>>, %arg8: memref<1x32xf32, #tpu.memory_space<vmem>>, %arg9: memref<32x128xf32, #tpu.memory_space<vmem>>, %arg10: memref<32x128xf32, #tpu.memory_space<vmem>>, %arg11: memref<1x128xf32, #tpu.memory_space<vmem>>, %arg12: memref<32x32xf32, #tpu.memory_space<vmem>>, %arg13: memref<1x32xf32, #tpu.memory_space<vmem>>, %arg14: memref<32x128xf32, #tpu.memory_space<vmem>>, %arg15: memref<1x128xf32, #tpu.memory_space<vmem>>, %arg16: memref<8x128xf32, #tpu.memory_space<vmem>>) attributes {dimension_semantics = [], scalar_prefetch = 0 : i64, scratch_operands = 0 : i64, tpu.core_type = #tpu.core_type<tc>} {
    %c0 = arith.constant 0 : index
    %c0_0 = arith.constant 0 : index
    %0 = vector.load %arg0[%c0, %c0_0] : memref<64x18xf32, #tpu.memory_space<vmem>>, vector<64x18xf32>
    %c0_1 = arith.constant 0 : index
    %c0_2 = arith.constant 0 : index
    %1 = vector.load %arg3[%c0_1, %c0_2] : memref<18x32xf32, #tpu.memory_space<vmem>>, vector<18x32xf32>
    %cst = arith.constant dense<0.000000e+00> : vector<64x32xf32>
    %2 = tpu.matmul %0, %1, %cst {dimension_numbers = #tpu.dot_dimension_numbers<[1], [0], [0], [1], [0, 0, 1, 1], [], []>} : vector<64x18xf32>, vector<18x32xf32>, vector<64x32xf32> -> vector<64x32xf32>
    %c0_3 = arith.constant 0 : index
    %c0_4 = arith.constant 0 : index
    %3 = vector.load %arg4[%c0_3, %c0_4] : memref<1x32xf32, #tpu.memory_space<vmem>>, vector<1x32xf32>
    %4 = vector.broadcast %3 : vector<1x32xf32> to vector<64x32xf32>
    %5 = arith.addf %2, %4 : vector<64x32xf32>
    %cst_5 = arith.constant 0.000000e+00 : f32
    %6 = vector.broadcast %cst_5 : f32 to vector<64x32xf32>
    %7 = arith.maximumf %5, %6 : vector<64x32xf32>
    %c0_6 = arith.constant 0 : index
    %c0_7 = arith.constant 0 : index
    %8 = vector.load %arg5[%c0_6, %c0_7] : memref<32x32xf32, #tpu.memory_space<vmem>>, vector<32x32xf32>
    %cst_8 = arith.constant dense<0.000000e+00> : vector<64x32xf32>
    %9 = tpu.matmul %7, %8, %cst_8 {dimension_numbers = #tpu.dot_dimension_numbers<[1], [0], [0], [1], [0, 0, 1, 1], [], []>} : vector<64x32xf32>, vector<32x32xf32>, vector<64x32xf32> -> vector<64x32xf32>
    %c0_9 = arith.constant 0 : index
    %c0_10 = arith.constant 0 : index
    %10 = vector.load %arg6[%c0_9, %c0_10] : memref<1x32xf32, #tpu.memory_space<vmem>>, vector<1x32xf32>
    %11 = vector.broadcast %10 : vector<1x32xf32> to vector<64x32xf32>
    %12 = arith.addf %9, %11 : vector<64x32xf32>
    %cst_11 = arith.constant 0.000000e+00 : f32
    %13 = vector.broadcast %cst_11 : f32 to vector<64x32xf32>
    %14 = arith.maximumf %12, %13 : vector<64x32xf32>
    %c0_12 = arith.constant 0 : index
    %c0_13 = arith.constant 0 : index
    %15 = vector.load %arg7[%c0_12, %c0_13] : memref<32x32xf32, #tpu.memory_space<vmem>>, vector<32x32xf32>
    %cst_14 = arith.constant dense<0.000000e+00> : vector<64x32xf32>
    %16 = tpu.matmul %14, %15, %cst_14 {dimension_numbers = #tpu.dot_dimension_numbers<[1], [0], [0], [1], [0, 0, 1, 1], [], []>} : vector<64x32xf32>, vector<32x32xf32>, vector<64x32xf32> -> vector<64x32xf32>
    %c0_15 = arith.constant 0 : index
    %c0_16 = arith.constant 0 : index
    %17 = vector.load %arg8[%c0_15, %c0_16] : memref<1x32xf32, #tpu.memory_space<vmem>>, vector<1x32xf32>
    %18 = vector.broadcast %17 : vector<1x32xf32> to vector<64x32xf32>
    %19 = arith.addf %16, %18 : vector<64x32xf32>
    %c0_17 = arith.constant 0 : index
    %c0_18 = arith.constant 0 : index
    %20 = vector.load %arg1[%c0_17, %c0_18] : memref<64x32xf32, #tpu.memory_space<vmem>>, vector<64x32xf32>
    %21 = arith.mulf %19, %20 : vector<64x32xf32>
    %c0_19 = arith.constant 0 : index
    %c0_20 = arith.constant 0 : index
    %22 = vector.load %arg9[%c0_19, %c0_20] : memref<32x128xf32, #tpu.memory_space<vmem>>, vector<32x128xf32>
    %cst_21 = arith.constant dense<0.000000e+00> : vector<64x128xf32>
    %23 = tpu.matmul %21, %22, %cst_21 {dimension_numbers = #tpu.dot_dimension_numbers<[1], [0], [0], [1], [0, 0, 1, 1], [], []>} : vector<64x32xf32>, vector<32x128xf32>, vector<64x128xf32> -> vector<64x128xf32>
    %c0_22 = arith.constant 0 : index
    %c0_23 = arith.constant 0 : index
    %24 = vector.load %arg11[%c0_22, %c0_23] : memref<1x128xf32, #tpu.memory_space<vmem>>, vector<1x128xf32>
    %25 = vector.broadcast %24 : vector<1x128xf32> to vector<64x128xf32>
    %26 = arith.addf %23, %25 : vector<64x128xf32>
    %c0_24 = arith.constant 0 : index
    %c0_25 = arith.constant 0 : index
    %27 = vector.load %arg10[%c0_24, %c0_25] : memref<32x128xf32, #tpu.memory_space<vmem>>, vector<32x128xf32>
    %c0_26 = arith.constant 0 : index
    %c0_27 = arith.constant 0 : index
    %28 = vector.load %arg2[%c0_26, %c0_27] : memref<8x32xf32, #tpu.memory_space<vmem>>, vector<8x32xf32>
    %cst_28 = arith.constant 0.000000e+00 : f32
    %29 = vector.broadcast %cst_28 : f32 to vector<8x32xf32>
    %cst_29 = arith.constant 0.000000e+00 : f32
    %30 = vector.broadcast %cst_29 : f32 to vector<8x32xf32>
    %31 = vector.extract_strided_slice %26 {offsets = [0, 0], sizes = [8, 128], strides = [1, 1]} : vector<64x128xf32> to vector<8x128xf32>
    %cst_30 = arith.constant dense<0.000000e+00> : vector<8x128xf32>
    %32 = tpu.matmul %29, %27, %cst_30 {dimension_numbers = #tpu.dot_dimension_numbers<[1], [0], [0], [1], [0, 0, 1, 1], [], []>} : vector<8x32xf32>, vector<32x128xf32>, vector<8x128xf32> -> vector<8x128xf32>
    %33 = arith.addf %31, %32 : vector<8x128xf32>
    %34 = arith.negf %33 : vector<8x128xf32>
    %35 = math.exp %34 : vector<8x128xf32>
    %cst_31 = arith.constant 1.000000e+00 : f32
    %36 = vector.broadcast %cst_31 : f32 to vector<8x128xf32>
    %37 = arith.addf %36, %35 : vector<8x128xf32>
    %38 = arith.divf %36, %37 : vector<8x128xf32>
    %39 = math.tanh %33 : vector<8x128xf32>
    %40 = vector.extract_strided_slice %38 {offsets = [0, 0], sizes = [8, 32], strides = [1, 1]} : vector<8x128xf32> to vector<8x32xf32>
    %41 = vector.extract_strided_slice %38 {offsets = [0, 32], sizes = [8, 32], strides = [1, 1]} : vector<8x128xf32> to vector<8x32xf32>
    %42 = vector.extract_strided_slice %39 {offsets = [0, 64], sizes = [8, 32], strides = [1, 1]} : vector<8x128xf32> to vector<8x32xf32>
    %43 = vector.extract_strided_slice %38 {offsets = [0, 96], sizes = [8, 32], strides = [1, 1]} : vector<8x128xf32> to vector<8x32xf32>
    %44 = arith.mulf %41, %30 : vector<8x32xf32>
    %45 = arith.mulf %40, %42 : vector<8x32xf32>
    %46 = arith.addf %44, %45 : vector<8x32xf32>
    %47 = math.tanh %46 : vector<8x32xf32>
    %48 = arith.mulf %43, %47 : vector<8x32xf32>
    %cst_32 = arith.constant 0.000000e+00 : f32
    %49 = vector.broadcast %cst_32 : f32 to vector<8x32xf32>
    %50 = arith.cmpf ogt, %28, %49 : vector<8x32xf32>
    %51 = arith.select %50, %48, %29 : vector<8x32xi1>, vector<8x32xf32>
    %52 = arith.select %50, %46, %30 : vector<8x32xi1>, vector<8x32xf32>
    %53 = vector.extract_strided_slice %26 {offsets = [8, 0], sizes = [8, 128], strides = [1, 1]} : vector<64x128xf32> to vector<8x128xf32>
    %cst_33 = arith.constant dense<0.000000e+00> : vector<8x128xf32>
    %54 = tpu.matmul %51, %27, %cst_33 {dimension_numbers = #tpu.dot_dimension_numbers<[1], [0], [0], [1], [0, 0, 1, 1], [], []>} : vector<8x32xf32>, vector<32x128xf32>, vector<8x128xf32> -> vector<8x128xf32>
    %55 = arith.addf %53, %54 : vector<8x128xf32>
    %56 = arith.negf %55 : vector<8x128xf32>
    %57 = math.exp %56 : vector<8x128xf32>
    %cst_34 = arith.constant 1.000000e+00 : f32
    %58 = vector.broadcast %cst_34 : f32 to vector<8x128xf32>
    %59 = arith.addf %58, %57 : vector<8x128xf32>
    %60 = arith.divf %58, %59 : vector<8x128xf32>
    %61 = math.tanh %55 : vector<8x128xf32>
    %62 = vector.extract_strided_slice %60 {offsets = [0, 0], sizes = [8, 32], strides = [1, 1]} : vector<8x128xf32> to vector<8x32xf32>
    %63 = vector.extract_strided_slice %60 {offsets = [0, 32], sizes = [8, 32], strides = [1, 1]} : vector<8x128xf32> to vector<8x32xf32>
    %64 = vector.extract_strided_slice %61 {offsets = [0, 64], sizes = [8, 32], strides = [1, 1]} : vector<8x128xf32> to vector<8x32xf32>
    %65 = vector.extract_strided_slice %60 {offsets = [0, 96], sizes = [8, 32], strides = [1, 1]} : vector<8x128xf32> to vector<8x32xf32>
    %66 = arith.mulf %63, %52 : vector<8x32xf32>
    %67 = arith.mulf %62, %64 : vector<8x32xf32>
    %68 = arith.addf %66, %67 : vector<8x32xf32>
    %69 = math.tanh %68 : vector<8x32xf32>
    %70 = arith.mulf %65, %69 : vector<8x32xf32>
    %cst_35 = arith.constant 1.000000e+00 : f32
    %71 = vector.broadcast %cst_35 : f32 to vector<8x32xf32>
    %72 = arith.cmpf ogt, %28, %71 : vector<8x32xf32>
    %73 = arith.select %72, %70, %51 : vector<8x32xi1>, vector<8x32xf32>
    %74 = arith.select %72, %68, %52 : vector<8x32xi1>, vector<8x32xf32>
    %75 = vector.extract_strided_slice %26 {offsets = [16, 0], sizes = [8, 128], strides = [1, 1]} : vector<64x128xf32> to vector<8x128xf32>
    %cst_36 = arith.constant dense<0.000000e+00> : vector<8x128xf32>
    %76 = tpu.matmul %73, %27, %cst_36 {dimension_numbers = #tpu.dot_dimension_numbers<[1], [0], [0], [1], [0, 0, 1, 1], [], []>} : vector<8x32xf32>, vector<32x128xf32>, vector<8x128xf32> -> vector<8x128xf32>
    %77 = arith.addf %75, %76 : vector<8x128xf32>
    %78 = arith.negf %77 : vector<8x128xf32>
    %79 = math.exp %78 : vector<8x128xf32>
    %cst_37 = arith.constant 1.000000e+00 : f32
    %80 = vector.broadcast %cst_37 : f32 to vector<8x128xf32>
    %81 = arith.addf %80, %79 : vector<8x128xf32>
    %82 = arith.divf %80, %81 : vector<8x128xf32>
    %83 = math.tanh %77 : vector<8x128xf32>
    %84 = vector.extract_strided_slice %82 {offsets = [0, 0], sizes = [8, 32], strides = [1, 1]} : vector<8x128xf32> to vector<8x32xf32>
    %85 = vector.extract_strided_slice %82 {offsets = [0, 32], sizes = [8, 32], strides = [1, 1]} : vector<8x128xf32> to vector<8x32xf32>
    %86 = vector.extract_strided_slice %83 {offsets = [0, 64], sizes = [8, 32], strides = [1, 1]} : vector<8x128xf32> to vector<8x32xf32>
    %87 = vector.extract_strided_slice %82 {offsets = [0, 96], sizes = [8, 32], strides = [1, 1]} : vector<8x128xf32> to vector<8x32xf32>
    %88 = arith.mulf %85, %74 : vector<8x32xf32>
    %89 = arith.mulf %84, %86 : vector<8x32xf32>
    %90 = arith.addf %88, %89 : vector<8x32xf32>
    %91 = math.tanh %90 : vector<8x32xf32>
    %92 = arith.mulf %87, %91 : vector<8x32xf32>
    %cst_38 = arith.constant 2.000000e+00 : f32
    %93 = vector.broadcast %cst_38 : f32 to vector<8x32xf32>
    %94 = arith.cmpf ogt, %28, %93 : vector<8x32xf32>
    %95 = arith.select %94, %92, %73 : vector<8x32xi1>, vector<8x32xf32>
    %96 = arith.select %94, %90, %74 : vector<8x32xi1>, vector<8x32xf32>
    %97 = vector.extract_strided_slice %26 {offsets = [24, 0], sizes = [8, 128], strides = [1, 1]} : vector<64x128xf32> to vector<8x128xf32>
    %cst_39 = arith.constant dense<0.000000e+00> : vector<8x128xf32>
    %98 = tpu.matmul %95, %27, %cst_39 {dimension_numbers = #tpu.dot_dimension_numbers<[1], [0], [0], [1], [0, 0, 1, 1], [], []>} : vector<8x32xf32>, vector<32x128xf32>, vector<8x128xf32> -> vector<8x128xf32>
    %99 = arith.addf %97, %98 : vector<8x128xf32>
    %100 = arith.negf %99 : vector<8x128xf32>
    %101 = math.exp %100 : vector<8x128xf32>
    %cst_40 = arith.constant 1.000000e+00 : f32
    %102 = vector.broadcast %cst_40 : f32 to vector<8x128xf32>
    %103 = arith.addf %102, %101 : vector<8x128xf32>
    %104 = arith.divf %102, %103 : vector<8x128xf32>
    %105 = math.tanh %99 : vector<8x128xf32>
    %106 = vector.extract_strided_slice %104 {offsets = [0, 0], sizes = [8, 32], strides = [1, 1]} : vector<8x128xf32> to vector<8x32xf32>
    %107 = vector.extract_strided_slice %104 {offsets = [0, 32], sizes = [8, 32], strides = [1, 1]} : vector<8x128xf32> to vector<8x32xf32>
    %108 = vector.extract_strided_slice %105 {offsets = [0, 64], sizes = [8, 32], strides = [1, 1]} : vector<8x128xf32> to vector<8x32xf32>
    %109 = vector.extract_strided_slice %104 {offsets = [0, 96], sizes = [8, 32], strides = [1, 1]} : vector<8x128xf32> to vector<8x32xf32>
    %110 = arith.mulf %107, %96 : vector<8x32xf32>
    %111 = arith.mulf %106, %108 : vector<8x32xf32>
    %112 = arith.addf %110, %111 : vector<8x32xf32>
    %113 = math.tanh %112 : vector<8x32xf32>
    %114 = arith.mulf %109, %113 : vector<8x32xf32>
    %cst_41 = arith.constant 3.000000e+00 : f32
    %115 = vector.broadcast %cst_41 : f32 to vector<8x32xf32>
    %116 = arith.cmpf ogt, %28, %115 : vector<8x32xf32>
    %117 = arith.select %116, %114, %95 : vector<8x32xi1>, vector<8x32xf32>
    %118 = arith.select %116, %112, %96 : vector<8x32xi1>, vector<8x32xf32>
    %119 = vector.extract_strided_slice %26 {offsets = [32, 0], sizes = [8, 128], strides = [1, 1]} : vector<64x128xf32> to vector<8x128xf32>
    %cst_42 = arith.constant dense<0.000000e+00> : vector<8x128xf32>
    %120 = tpu.matmul %117, %27, %cst_42 {dimension_numbers = #tpu.dot_dimension_numbers<[1], [0], [0], [1], [0, 0, 1, 1], [], []>} : vector<8x32xf32>, vector<32x128xf32>, vector<8x128xf32> -> vector<8x128xf32>
    %121 = arith.addf %119, %120 : vector<8x128xf32>
    %122 = arith.negf %121 : vector<8x128xf32>
    %123 = math.exp %122 : vector<8x128xf32>
    %cst_43 = arith.constant 1.000000e+00 : f32
    %124 = vector.broadcast %cst_43 : f32 to vector<8x128xf32>
    %125 = arith.addf %124, %123 : vector<8x128xf32>
    %126 = arith.divf %124, %125 : vector<8x128xf32>
    %127 = math.tanh %121 : vector<8x128xf32>
    %128 = vector.extract_strided_slice %126 {offsets = [0, 0], sizes = [8, 32], strides = [1, 1]} : vector<8x128xf32> to vector<8x32xf32>
    %129 = vector.extract_strided_slice %126 {offsets = [0, 32], sizes = [8, 32], strides = [1, 1]} : vector<8x128xf32> to vector<8x32xf32>
    %130 = vector.extract_strided_slice %127 {offsets = [0, 64], sizes = [8, 32], strides = [1, 1]} : vector<8x128xf32> to vector<8x32xf32>
    %131 = vector.extract_strided_slice %126 {offsets = [0, 96], sizes = [8, 32], strides = [1, 1]} : vector<8x128xf32> to vector<8x32xf32>
    %132 = arith.mulf %129, %118 : vector<8x32xf32>
    %133 = arith.mulf %128, %130 : vector<8x32xf32>
    %134 = arith.addf %132, %133 : vector<8x32xf32>
    %135 = math.tanh %134 : vector<8x32xf32>
    %136 = arith.mulf %131, %135 : vector<8x32xf32>
    %cst_44 = arith.constant 4.000000e+00 : f32
    %137 = vector.broadcast %cst_44 : f32 to vector<8x32xf32>
    %138 = arith.cmpf ogt, %28, %137 : vector<8x32xf32>
    %139 = arith.select %138, %136, %117 : vector<8x32xi1>, vector<8x32xf32>
    %140 = arith.select %138, %134, %118 : vector<8x32xi1>, vector<8x32xf32>
    %141 = vector.extract_strided_slice %26 {offsets = [40, 0], sizes = [8, 128], strides = [1, 1]} : vector<64x128xf32> to vector<8x128xf32>
    %cst_45 = arith.constant dense<0.000000e+00> : vector<8x128xf32>
    %142 = tpu.matmul %139, %27, %cst_45 {dimension_numbers = #tpu.dot_dimension_numbers<[1], [0], [0], [1], [0, 0, 1, 1], [], []>} : vector<8x32xf32>, vector<32x128xf32>, vector<8x128xf32> -> vector<8x128xf32>
    %143 = arith.addf %141, %142 : vector<8x128xf32>
    %144 = arith.negf %143 : vector<8x128xf32>
    %145 = math.exp %144 : vector<8x128xf32>
    %cst_46 = arith.constant 1.000000e+00 : f32
    %146 = vector.broadcast %cst_46 : f32 to vector<8x128xf32>
    %147 = arith.addf %146, %145 : vector<8x128xf32>
    %148 = arith.divf %146, %147 : vector<8x128xf32>
    %149 = math.tanh %143 : vector<8x128xf32>
    %150 = vector.extract_strided_slice %148 {offsets = [0, 0], sizes = [8, 32], strides = [1, 1]} : vector<8x128xf32> to vector<8x32xf32>
    %151 = vector.extract_strided_slice %148 {offsets = [0, 32], sizes = [8, 32], strides = [1, 1]} : vector<8x128xf32> to vector<8x32xf32>
    %152 = vector.extract_strided_slice %149 {offsets = [0, 64], sizes = [8, 32], strides = [1, 1]} : vector<8x128xf32> to vector<8x32xf32>
    %153 = vector.extract_strided_slice %148 {offsets = [0, 96], sizes = [8, 32], strides = [1, 1]} : vector<8x128xf32> to vector<8x32xf32>
    %154 = arith.mulf %151, %140 : vector<8x32xf32>
    %155 = arith.mulf %150, %152 : vector<8x32xf32>
    %156 = arith.addf %154, %155 : vector<8x32xf32>
    %157 = math.tanh %156 : vector<8x32xf32>
    %158 = arith.mulf %153, %157 : vector<8x32xf32>
    %cst_47 = arith.constant 5.000000e+00 : f32
    %159 = vector.broadcast %cst_47 : f32 to vector<8x32xf32>
    %160 = arith.cmpf ogt, %28, %159 : vector<8x32xf32>
    %161 = arith.select %160, %158, %139 : vector<8x32xi1>, vector<8x32xf32>
    %162 = arith.select %160, %156, %140 : vector<8x32xi1>, vector<8x32xf32>
    %163 = vector.extract_strided_slice %26 {offsets = [48, 0], sizes = [8, 128], strides = [1, 1]} : vector<64x128xf32> to vector<8x128xf32>
    %cst_48 = arith.constant dense<0.000000e+00> : vector<8x128xf32>
    %164 = tpu.matmul %161, %27, %cst_48 {dimension_numbers = #tpu.dot_dimension_numbers<[1], [0], [0], [1], [0, 0, 1, 1], [], []>} : vector<8x32xf32>, vector<32x128xf32>, vector<8x128xf32> -> vector<8x128xf32>
    %165 = arith.addf %163, %164 : vector<8x128xf32>
    %166 = arith.negf %165 : vector<8x128xf32>
    %167 = math.exp %166 : vector<8x128xf32>
    %cst_49 = arith.constant 1.000000e+00 : f32
    %168 = vector.broadcast %cst_49 : f32 to vector<8x128xf32>
    %169 = arith.addf %168, %167 : vector<8x128xf32>
    %170 = arith.divf %168, %169 : vector<8x128xf32>
    %171 = math.tanh %165 : vector<8x128xf32>
    %172 = vector.extract_strided_slice %170 {offsets = [0, 0], sizes = [8, 32], strides = [1, 1]} : vector<8x128xf32> to vector<8x32xf32>
    %173 = vector.extract_strided_slice %170 {offsets = [0, 32], sizes = [8, 32], strides = [1, 1]} : vector<8x128xf32> to vector<8x32xf32>
    %174 = vector.extract_strided_slice %171 {offsets = [0, 64], sizes = [8, 32], strides = [1, 1]} : vector<8x128xf32> to vector<8x32xf32>
    %175 = vector.extract_strided_slice %170 {offsets = [0, 96], sizes = [8, 32], strides = [1, 1]} : vector<8x128xf32> to vector<8x32xf32>
    %176 = arith.mulf %173, %162 : vector<8x32xf32>
    %177 = arith.mulf %172, %174 : vector<8x32xf32>
    %178 = arith.addf %176, %177 : vector<8x32xf32>
    %179 = math.tanh %178 : vector<8x32xf32>
    %180 = arith.mulf %175, %179 : vector<8x32xf32>
    %cst_50 = arith.constant 6.000000e+00 : f32
    %181 = vector.broadcast %cst_50 : f32 to vector<8x32xf32>
    %182 = arith.cmpf ogt, %28, %181 : vector<8x32xf32>
    %183 = arith.select %182, %180, %161 : vector<8x32xi1>, vector<8x32xf32>
    %184 = arith.select %182, %178, %162 : vector<8x32xi1>, vector<8x32xf32>
    %185 = vector.extract_strided_slice %26 {offsets = [56, 0], sizes = [8, 128], strides = [1, 1]} : vector<64x128xf32> to vector<8x128xf32>
    %cst_51 = arith.constant dense<0.000000e+00> : vector<8x128xf32>
    %186 = tpu.matmul %183, %27, %cst_51 {dimension_numbers = #tpu.dot_dimension_numbers<[1], [0], [0], [1], [0, 0, 1, 1], [], []>} : vector<8x32xf32>, vector<32x128xf32>, vector<8x128xf32> -> vector<8x128xf32>
    %187 = arith.addf %185, %186 : vector<8x128xf32>
    %188 = arith.negf %187 : vector<8x128xf32>
    %189 = math.exp %188 : vector<8x128xf32>
    %cst_52 = arith.constant 1.000000e+00 : f32
    %190 = vector.broadcast %cst_52 : f32 to vector<8x128xf32>
    %191 = arith.addf %190, %189 : vector<8x128xf32>
    %192 = arith.divf %190, %191 : vector<8x128xf32>
    %193 = math.tanh %187 : vector<8x128xf32>
    %194 = vector.extract_strided_slice %192 {offsets = [0, 0], sizes = [8, 32], strides = [1, 1]} : vector<8x128xf32> to vector<8x32xf32>
    %195 = vector.extract_strided_slice %192 {offsets = [0, 32], sizes = [8, 32], strides = [1, 1]} : vector<8x128xf32> to vector<8x32xf32>
    %196 = vector.extract_strided_slice %193 {offsets = [0, 64], sizes = [8, 32], strides = [1, 1]} : vector<8x128xf32> to vector<8x32xf32>
    %197 = vector.extract_strided_slice %192 {offsets = [0, 96], sizes = [8, 32], strides = [1, 1]} : vector<8x128xf32> to vector<8x32xf32>
    %198 = arith.mulf %195, %184 : vector<8x32xf32>
    %199 = arith.mulf %194, %196 : vector<8x32xf32>
    %200 = arith.addf %198, %199 : vector<8x32xf32>
    %201 = math.tanh %200 : vector<8x32xf32>
    %202 = arith.mulf %197, %201 : vector<8x32xf32>
    %cst_53 = arith.constant 7.000000e+00 : f32
    %203 = vector.broadcast %cst_53 : f32 to vector<8x32xf32>
    %204 = arith.cmpf ogt, %28, %203 : vector<8x32xf32>
    %205 = arith.select %204, %202, %183 : vector<8x32xi1>, vector<8x32xf32>
    %c0_54 = arith.constant 0 : index
    %c0_55 = arith.constant 0 : index
    %206 = vector.load %arg12[%c0_54, %c0_55] : memref<32x32xf32, #tpu.memory_space<vmem>>, vector<32x32xf32>
    %cst_56 = arith.constant dense<0.000000e+00> : vector<8x32xf32>
    %207 = tpu.matmul %205, %206, %cst_56 {dimension_numbers = #tpu.dot_dimension_numbers<[1], [0], [0], [1], [0, 0, 1, 1], [], []>} : vector<8x32xf32>, vector<32x32xf32>, vector<8x32xf32> -> vector<8x32xf32>
    %c0_57 = arith.constant 0 : index
    %c0_58 = arith.constant 0 : index
    %208 = vector.load %arg13[%c0_57, %c0_58] : memref<1x32xf32, #tpu.memory_space<vmem>>, vector<1x32xf32>
    %209 = vector.broadcast %208 : vector<1x32xf32> to vector<8x32xf32>
    %210 = arith.addf %207, %209 : vector<8x32xf32>
    %cst_59 = arith.constant 0.000000e+00 : f32
    %211 = vector.broadcast %cst_59 : f32 to vector<8x32xf32>
    %212 = arith.maximumf %210, %211 : vector<8x32xf32>
    %c0_60 = arith.constant 0 : index
    %c0_61 = arith.constant 0 : index
    %213 = vector.load %arg14[%c0_60, %c0_61] : memref<32x128xf32, #tpu.memory_space<vmem>>, vector<32x128xf32>
    %cst_62 = arith.constant dense<0.000000e+00> : vector<8x128xf32>
    %214 = tpu.matmul %212, %213, %cst_62 {dimension_numbers = #tpu.dot_dimension_numbers<[1], [0], [0], [1], [0, 0, 1, 1], [], []>} : vector<8x32xf32>, vector<32x128xf32>, vector<8x128xf32> -> vector<8x128xf32>
    %c0_63 = arith.constant 0 : index
    %c0_64 = arith.constant 0 : index
    %215 = vector.load %arg15[%c0_63, %c0_64] : memref<1x128xf32, #tpu.memory_space<vmem>>, vector<1x128xf32>
    %216 = vector.broadcast %215 : vector<1x128xf32> to vector<8x128xf32>
    %217 = arith.addf %214, %216 : vector<8x128xf32>
    %218 = arith.negf %217 : vector<8x128xf32>
    %219 = math.exp %218 : vector<8x128xf32>
    %cst_65 = arith.constant 1.000000e+00 : f32
    %220 = vector.broadcast %cst_65 : f32 to vector<8x128xf32>
    %221 = arith.addf %220, %219 : vector<8x128xf32>
    %222 = arith.divf %220, %221 : vector<8x128xf32>
    %c0_66 = arith.constant 0 : index
    %c0_67 = arith.constant 0 : index
    %223 = vector.load %arg16[%c0_66, %c0_67] : memref<8x128xf32, #tpu.memory_space<vmem>>, vector<8x128xf32>
    tpu.vector_store %arg16[%c0_66, %c0_67], %222 {strides = array<i32>} : memref<8x128xf32, #tpu.memory_space<vmem>>, vector<8x128xf32>,
    return
  }
}

</mosaic_0001>

<bundles_post_ra>
// kernel: tpu_custom_call.1
= control target key start
LH: loop header
LB: loop body
LE: loop exit
PB: predicated region body
PF: predicated region fallthrough
CT: control target
= control target key end

     0   :  { %s2940_s0 = inlined_call_operand.vmem [shape: f32[64,18], index: 0, kind: input, shape index: {}]   ;;  %s2941_s1 = inlined_call_operand.vmem [shape: f32[64,32], index: 1, kind: input, shape index: {}]   ;;  %s2942_s2 = inlined_call_operand.hbm [shape: f32[8,32], index: 2, kind: input, shape index: {}]   ;;  %s2943_s3 = inlined_call_operand.hbm [shape: f32[18,32], index: 3, kind: input, shape index: {}]   ;;  %s2944_s4 = inlined_call_operand.vmem [shape: f32[1,32], index: 4, kind: input, shape index: {}]   ;;  %s2945_s5 = inlined_call_operand.vmem [shape: f32[32,32], index: 5, kind: input, shape index: {}]   ;;  %s2946_s6 = inlined_call_operand.hbm [shape: f32[1,32], index: 6, kind: input, shape index: {}]   ;;  %s2947_s7 = inlined_call_operand.vmem [shape: f32[32,32], index: 7, kind: input, shape index: {}]   ;;  %s2948_s8 = inlined_call_operand.hbm [shape: f32[1,32], index: 8, kind: input, shape index: {}]   ;;  %s2949_s9 = inlined_call_operand.vmem [shape: f32[32,128], index: 9, kind: input, shape index: {}]   ;;  %s2950_s10 = inlined_call_operand.vmem [shape: f32[32,128], index: 10, kind: input, shape index: {}]   ;;  %s2951_s11 = inlined_call_operand.hbm [shape: f32[1,128], index: 11, kind: input, shape index: {}]   ;;  %s2952_s12 = inlined_call_operand.vmem [shape: f32[32,32], index: 12, kind: input, shape index: {}]   ;;  %s2953_s13 = inlined_call_operand.vmem [shape: f32[1,32], index: 13, kind: input, shape index: {}]   ;;  %s2954_s14 = inlined_call_operand.vmem [shape: f32[32,128], index: 14, kind: input, shape index: {}]   ;;  %s2955_s15 = inlined_call_operand.vmem [shape: f32[1,128], index: 15, kind: input, shape index: {}]   ;;  %s2956_s16 = inlined_call_operand.hbm [shape: f32[8,128], index: 16, kind: output, shape index: {}]  }
   0x1   :  { %2959 = sst [smem:[#allocation16_spill]] %s2940_s0 }
   0x2   :  { %2960 = sst [smem:[#allocation17_spill]] %s2956_s16 }
   0x3   :  { %21 = vsyncpa [#allocation3], 0 }
   0x4   :  { %22 = vsyncpa [#allocation6], 0 }
   0x5   :  { %23 = vsyncpa [#allocation9], 0 }
   0x6   :  { %24 = vsyncpa [#allocation4], 0  ;;  %s2464_s21 = smov [#allocation5]   ;;  %s2324_s25 = scalar_lea.hbm %s2943_s3, 384 }
   0x7   :  { %s44_s22 = sshll.u32 %s2464_s21, 4  ;;  %p2325_p0 = scmp.ne.s32.totalorder %s2943_s3, %s2324_s25  ;;  %s45_s22 = int_to_ptr.vmem [resolvable:$true] %s44_s22 }
   0x8   :  { %p2328_p1 = scmp.lt.u32.totalorder %s2324_s25, %s2943_s3 }
   0xa   :  { %p2330_p2 = pnand %p2328_p1, %p2325_p0 }
   0xc   :  { %2333 = shalt.err (!%p2330_p2)
}
   0xd   :  { %s2334_s30 = scalar_lea.vmem %s45_s22, 384  ;;  %p2339_p4 = scmp.lt.s32.totalorder %s45_s22, %s45_s22 }
   0xe   :  { %p2335_p3 = scmp.ne.s32.totalorder %s45_s22, %s2334_s30  ;;  %p2340_p5 = scmp.lt.s32.totalorder %s2334_s30, %s2334_s30 }
  0x10   :  { %p2341_p6 = por %p2340_p5, %p2339_p4 }
  0x12   :  { %p2342_p7 = pnand %p2341_p6, %p2335_p3 }
  0x14   :  { %2345 = shalt.err (!%p2342_p7)
}
  0x15   :  { %s2465_s0 = smov 128   ;;  %s2466_s17 = smov 8  }
  0x16   :  { %50 = dma.hbm_to_vmem [thread:$0]  %s2943_s3, 384, %s45_s22, [#allocation6], %s2465_s0, %s2465_s0, %s2466_s17  }
  0x17   :  { %s2467_s20 = smov [#allocation8]   ;;  %s2468_s23 = smov [#allocation2]  }
  0x18   :  { %s73_s21 = sshll.u32 %s2467_s20, 4  ;;  %s35_s24 = sshll.u32 %s2468_s23, 4  ;;  %s74_s21 = int_to_ptr.vmem [resolvable:$true] %s73_s21  ;;  %s36_s24 = int_to_ptr.vmem [resolvable:$true] %s35_s24 }
  0x19   :  { %s2346_s27 = scalar_lea.hbm %s2948_s8, 16 }
  0x1a   :  { %p2347_p8 = scmp.ne.s32.totalorder %s2948_s8, %s2346_s27  ;;  %p2350_p9 = scmp.lt.u32.totalorder %s2346_s27, %s2948_s8 }
  0x1c   :  { %p2352_p10 = pnand %p2350_p9, %p2347_p8 }
  0x1e   :  { %2355 = shalt.err (!%p2352_p10)
}
  0x1f   :  { %s2356_s3 = scalar_lea.vmem %s74_s21, 16  ;;  %s2360_s22 = scalar_lea.vmem %s74_s21, 32 }
  0x20   :  { %p2357_p11 = scmp.ne.s32.totalorder %s74_s21, %s2356_s3  ;;  %p2361_p12 = scmp.lt.s32.totalorder %s74_s21, %s74_s21 }
  0x21   :  { %p2362_p13 = scmp.lt.s32.totalorder %s2360_s22, %s2356_s3 }
  0x23   :  { %p2363_p0 = por %p2362_p13, %p2361_p12 }
  0x25   :  { %p2364_p1 = pnand %p2363_p0, %p2357_p11 }
  0x27   :  { %2367 = shalt.err (!%p2364_p1)
}
  0x28   :  { %76 = dma.hbm_to_vmem [thread:$0]  %s2948_s8, 16, %s74_s21, [#allocation9]  }
  0x29   :  { %s2368_s16 = scalar_lea.hbm %s2942_s2, 128 }
  0x2a   :  { %p2369_p2 = scmp.ne.s32.totalorder %s2942_s2, %s2368_s16  ;;  %p2372_p3 = scmp.lt.u32.totalorder %s2368_s16, %s2942_s2 }
  0x2c   :  { %p2374_p4 = pnand %p2372_p3, %p2369_p2 }
  0x2e   :  { %2377 = shalt.err (!%p2374_p4)
}
  0x2f   :  { %s2378_s27 = scalar_lea.vmem %s36_s24, 128  ;;  %p2383_p6 = scmp.lt.s32.totalorder %s36_s24, %s36_s24 }
  0x30   :  { %p2379_p5 = scmp.ne.s32.totalorder %s36_s24, %s2378_s27  ;;  %p2384_p7 = scmp.lt.s32.totalorder %s2378_s27, %s2378_s27 }
  0x32   :  { %p2385_p8 = por %p2384_p7, %p2383_p6 }
  0x34   :  { %p2386_p9 = pnand %p2385_p8, %p2379_p5 }
  0x36   :  { %2389 = shalt.err (!%p2386_p9)
}
  0x37   :  { %38 = dma.hbm_to_vmem [thread:$0]  %s2942_s2, 128, %s36_s24, [#allocation3]  }
  0x38   :  { %s2469_s28 = smov [#allocation7]   ;;  %s2470_s30 = smov [#allocation10]  }
  0x39   :  { %s61_s29 = sshll.u32 %s2469_s28, 4  ;;  %s87_s3 = sshll.u32 %s2470_s30, 4  ;;  %s62_s29 = int_to_ptr.vmem [resolvable:$true] %s61_s29  ;;  %s88_s3 = int_to_ptr.vmem [resolvable:$true] %s87_s3 }
  0x3a   :  { %s2390_s17 = scalar_lea.hbm %s2946_s6, 16 }
  0x3b   :  { %p2391_p10 = scmp.ne.s32.totalorder %s2946_s6, %s2390_s17  ;;  %p2394_p11 = scmp.lt.u32.totalorder %s2390_s17, %s2946_s6 }
  0x3d   :  { %p2396_p12 = pnand %p2394_p11, %p2391_p10 }
  0x3f   :  { %2399 = shalt.err (!%p2396_p12)
}
  0x40   :  { %s2400_s2 = scalar_lea.vmem %s62_s29, 16  ;;  %s2404_s24 = scalar_lea.vmem %s62_s29, 32 }
  0x41   :  { %p2401_p13 = scmp.ne.s32.totalorder %s62_s29, %s2400_s2  ;;  %p2405_p0 = scmp.lt.s32.totalorder %s62_s29, %s62_s29 }
  0x42   :  { %p2406_p1 = scmp.lt.s32.totalorder %s2404_s24, %s2400_s2 }
  0x44   :  { %p2407_p2 = por %p2406_p1, %p2405_p0 }
  0x46   :  { %p2408_p3 = pnand %p2407_p2, %p2401_p13 }
  0x48   :  { %2411 = shalt.err (!%p2408_p3)
}
  0x49   :  { %64 = dma.hbm_to_vmem [thread:$0]  %s2946_s6, 16, %s62_s29, [#allocation6]  }
  0x4a   :  { %s2412_s8 = scalar_lea.hbm %s2951_s11, 16 }
  0x4b   :  { %p2413_p4 = scmp.ne.s32.totalorder %s2951_s11, %s2412_s8  ;;  %p2416_p5 = scmp.lt.u32.totalorder %s2412_s8, %s2951_s11 }
  0x4d   :  { %p2418_p6 = pnand %p2416_p5, %p2413_p4 }
  0x4f   :  { %2421 = shalt.err (!%p2418_p6)
}
  0x50   :  { %s2422_s0 = scalar_lea.vmem %s88_s3, 16  ;;  %s2426_s17 = scalar_lea.vmem %s88_s3, 32 }
  0x51   :  { %p2423_p7 = scmp.ne.s32.totalorder %s88_s3, %s2422_s0  ;;  %p2427_p8 = scmp.lt.s32.totalorder %s88_s3, %s88_s3 }
  0x52   :  { %p2428_p9 = scmp.lt.s32.totalorder %s2426_s17, %s2422_s0 }
  0x54   :  { %p2429_p10 = por %p2428_p9, %p2427_p8 }
  0x56   :  { %p2430_p11 = pnand %p2429_p10, %p2423_p7 }
  0x58   :  { %2433 = shalt.err (!%p2430_p11)
}
  0x59   :  { %90 = dma.hbm_to_vmem [thread:$0]  %s2951_s11, 16, %s88_s3, [#allocation9]  }
  0x5a   :  { %2456 = dma.done.wait [#allocation3], 128  }
  0x5b   :  { %2457 = vsyncadd [#allocation3], 4294967168 }
  0x5c   :  { %2458 = dma.done.wait [#allocation6], 400  }
  0x5d   :  { %2459 = vsyncadd [#allocation6], 4294966896 }
  0x5e   :  { %2460 = dma.done.wait [#allocation9], 32  }
  0x5f   :  { %2461 = vsyncadd [#allocation9], 4294967264  ;;  %vm132_vm0 = vcmask 146432   ;;  %v122_v0 = vld [vmem:[#allocation5] sm:$0xff]  ;;  %v123_v1 = vld [vmem:[#allocation5 + $0x8] sm:$0xff]  ;;  %s2961_s16 = sld [smem:[#allocation16_spill]] }
  0x60   :  { %v2154_v2 = vpack.c.bf16 %v123_v1, %v122_v0  ;;  %v124_v4 = vld [vmem:[#allocation5 + $0x10] sm:$0x3]  ;;  %vm157_vm1 = vcmask 1041408   ;;  %v274_v5 = vld [vmem:[%s2945_s5] sm:$0xff]  ;;  %v275_v6 = vld [vmem:[%s2945_s5 + $0x8] sm:$0xff]  ;;  %vm285_vm2 = vcmask 261120  }
  0x61   :  { %v2158_v7 = vpack.c.bf16 %v275_v6, %v274_v5  ;;  %v276_v15 = vld [vmem:[%s2945_s5 + $0x10] sm:$0xff]  ;;  %v277_v16 = vld [vmem:[%s2945_s5 + $0x18] sm:$0xff]  ;;  %v423_v18 = vld [vmem:[%s2947_s7] sm:$0xff]  ;;  %v2471_v52 = vmov 0.0|0.0   ;;  %vm2472_vm3 = vmmov 0   ;;  %s2475_s0 = smov 32  }
  0x62   :  { %2155 = vmatprep.subr.bf16.mxu0 %v2154_v2  ;;  %v2162_v17 = vpack.c.bf16 %v277_v16, %v276_v15  ;;  %v424_v19 = vld [vmem:[%s2947_s7 + $0x8] sm:$0xff]  ;;  %v425_v21 = vld [vmem:[%s2947_s7 + $0x10] sm:$0xff]  ;;  %v426_v22 = vld [vmem:[%s2947_s7 + $0x18] sm:$0xff]  ;;  %s2476_s17 = smov 96  }
  0x63   :  { %2157 = vmatpush3.bf16.msra.mxu0 %v2154_v2  ;;  %2159 = vmatprep.subr.bf16.mxu1 %v2158_v7  ;;  %v2166_v20 = vpack.c.bf16 %v424_v19, %v423_v18  ;;  %v2170_v23 = vpack.c.bf16 %v426_v22, %v425_v21  ;;  %v1812_v24 = vld [vmem:[%s2944_s4] ss:$0 sm:$0xff]  ;;  %v580_v50 = vld [vmem:[%s2949_s9 + $0x8] sm:$0xff]  ;;  %v581_v53 = vld [vmem:[%s2949_s9 + $0x10] sm:$0xff] }
  0x64   :  { %1970 = vmatprep.subr.msk.mxu0 %vm157_vm1, %v124_v4  ;;  %2161 = vmatpush3.bf16.msra.mxu1 %v2158_v7  ;;  %v579_v49 = vld [vmem:[%s2949_s9] sm:$0xff]  ;;  %v582_v54 = vld [vmem:[%s2949_s9 + $0x18] sm:$0xff]  ;;  %v720_v61 = vld [vmem:[%s2950_s10 + $0x8] sm:$0xff] }
  0x65   :  { %v114_v3 = vld [vmem:[%s2961_s16] sm:$0xff]  ;;  %v115_v8 = vld [vmem:[%s2961_s16 + $0x8] sm:$0xff]  ;;  %v116_v9 = vld [vmem:[%s2961_s16 + $0x10] sm:$0xff]  ;;  %2163 = vmatprep.subr.bf16.mxu1 %v2162_v17  ;;  %v2174_v51 = vpack.c.bf16 %v580_v50, %v579_v49  ;;  %v2178_v55 = vpack.c.bf16 %v582_v54, %v581_v53 }
  0x66   :  { %1972 = vmatprep.mubr.msk.f32.mxu0 %vm132_vm0, %v114_v3  ;;  %v117_v10 = vld [vmem:[%s2961_s16 + $0x18] sm:$0xff]  ;;  %v118_v11 = vld [vmem:[%s2961_s16 + $0x20] sm:$0xff]  ;;  %v119_v12 = vld [vmem:[%s2961_s16 + $0x28] sm:$0xff] }
  0x67   :  { %1971 = vmatpush3.msk.msra.mxu0 %vm157_vm1, %v124_v4  ;;  %v120_v13 = vld [vmem:[%s2961_s16 + $0x30] sm:$0xff]  ;;  %v121_v14 = vld [vmem:[%s2961_s16 + $0x38] sm:$0xff]  ;;  %v1822_v56 = vld [vmem:[#allocation7] ss:$0 sm:$0xff] }
  0x68   :  { %1973 = vmatmul.mubr.msk.f32.vlgmr.msra.gmra.mrb[0].mxu0 %vm132_vm0, %v115_v8  ;;  %2165 = vmatpush3.bf16.msra.mxu1 %v2162_v17  ;;  %v719_v60 = vld [vmem:[%s2950_s10] sm:$0xff]  ;;  %v722_v21 = vld [vmem:[%s2950_s10 + $0x18] sm:$0xff]  ;;  %v569_v54 = vld [vmem:[%s2941_s1 + $0x30] sm:$0xff] }
  0x69   :  { %1975 = vmatprep.mubr.msk.f32.mxu0 %vm132_vm0, %v116_v9  ;;  %2167 = vmatprep.subr.bf16.mxu0 %v2166_v20  ;;  %v2710_v1 = vpack.c.bf16 %v720_v61, %v719_v60  ;;  %v570_v50 = vld [vmem:[%s2941_s1 + $0x38] sm:$0xff]  ;;  %v1840_v60 = vld [vmem:[#allocation10] ss:$0 sm:$0xff] }
  0x6a   :  { %2169 = vmatpush3.bf16.msra.mxu0 %v2166_v20  ;;  %2175 = vmatprep.subr.bf16.mxu1 %v2174_v51  ;;  %v721_v20 = vld [vmem:[%s2950_s10 + $0x10] sm:$0xff] }
  0x6b   :  { %2171 = vmatprep.subr.bf16.mxu0 %v2170_v23  ;;  %v2728_v22 = vpack.c.bf16 %v722_v21, %v721_v20 }
  0x6c   :  { %1976 = vmatmul.mubr.msk.f32.gmra.mrb[2].mxu0 %vm132_vm0, %v117_v10 }
  0x6d   :  { %1978 = vmatprep.mubr.msk.f32.mxu0 %vm132_vm0, %v118_v11 }
  0x6e   :  { %2173 = vmatpush3.bf16.msra.mxu0 %v2170_v23  ;;  %v2473_v23 = vmov 0.0  }
  0x6f   :  { %2182 = vmatprep.subr.bf16.mxu0 %v2471_v52 }
  0x70   :  { %1979 = vmatmul.mubr.msk.f32.gmra.mrb[4].mxu0 %vm132_vm0, %v119_v12 }
  0x71   :  { %1981 = vmatprep.mubr.msk.f32.mxu0 %vm132_vm0, %v120_v13 }
  0x74   :  { %1982 = vmatmul.mubr.msk.f32.gmra.mrb[6].mxu0 %vm132_vm0, %v121_v14 }
 0x13b   :  { %v1974_v25 = vpop.f32.mrb[0].mxu0 }
 0x13c   :  { %v233_v26 = vadd.f32 %v1974_v25, %v1812_v24  ;;  %v227_v27 = vpop.f32.mrb[1].mxu0 }
 0x13d   :  { %v228_v28 = vadd.f32 %v1812_v24, %v227_v27 }
 0x13e   :  { %v267_v31 = vmax.f32 %v233_v26, 0.0 }
 0x13f   :  { %v266_v29 = vmax.f32 %v228_v28, 0.0  ;;  %v1977_v30 = vpop.f32.mrb[2].mxu0  ;;  %v563_v28 = vld [vmem:[%s2941_s1] sm:$0xff] }
 0x140   :  { %v243_v32 = vadd.f32 %v1977_v30, %v1812_v24  ;;  %v237_v33 = vpop.f32.mrb[3].mxu0 }
 0x141   :  { %1992 = vmatprep.mubr.msk.f32.mxu1 %vm285_vm2, %v266_v29  ;;  %v238_v34 = vadd.f32 %v1812_v24, %v237_v33  ;;  %v564_v29 = vld [vmem:[%s2941_s1 + $0x8] sm:$0xff]  ;;  %v566_v33 = vld [vmem:[%s2941_s1 + $0x18] sm:$0xff] }
 0x142   :  { %1993 = vmatmul.mubr.msk.f32.vlgmr.msra.gmra.mrb[0].mxu1 %vm285_vm2, %v267_v31  ;;  %v269_v35 = vmax.f32 %v243_v32, 0.0 }
 0x143   :  { %v268_v36 = vmax.f32 %v238_v34, 0.0  ;;  %v1980_v37 = vpop.f32.mrb[4].mxu0  ;;  %2177 = vmatpush3.bf16.msra.mxu1 %v2174_v51 }
 0x144   :  { %v253_v38 = vadd.f32 %v1980_v37, %v1812_v24  ;;  %v247_v39 = vpop.f32.mrb[5].mxu0  ;;  %2179 = vmatprep.subr.bf16.mxu1 %v2178_v55  ;;  %v565_v37 = vld [vmem:[%s2941_s1 + $0x10] sm:$0xff] }
 0x145   :  { %v248_v40 = vadd.f32 %v1812_v24, %v247_v39  ;;  %1995 = vmatprep.mubr.msk.f32.mxu1 %vm285_vm2, %v268_v36 }
 0x146   :  { %v271_v41 = vmax.f32 %v253_v38, 0.0  ;;  %1996 = vmatmul.mubr.msk.f32.gmra.mrb[2].mxu1 %vm285_vm2, %v269_v35 }
 0x147   :  { %v270_v42 = vmax.f32 %v248_v40, 0.0  ;;  %v1983_v43 = vpop.f32.mrb[6].mxu0  ;;  %2181 = vmatpush3.bf16.msra.mxu1 %v2178_v55 }
 0x148   :  { %v263_v44 = vadd.f32 %v1983_v43, %v1812_v24  ;;  %v257_v45 = vpop.f32.mrb[7].mxu0  ;;  %2188 = vmatprep.subr.bf16.mxu1 %v2471_v52 }
 0x149   :  { %v258_v46 = vadd.f32 %v1812_v24, %v257_v45  ;;  %1998 = vmatprep.mubr.msk.f32.mxu1 %vm285_vm2, %v270_v42  ;;  %v1831_v24 = vld [vmem:[#allocation8] ss:$0 sm:$0xff]  ;;  %v568_v42 = vld [vmem:[%s2941_s1 + $0x28] sm:$0xff] }
 0x14a   :  { %v273_v47 = vmax.f32 %v263_v44, 0.0  ;;  %1999 = vmatmul.mubr.msk.f32.gmra.mrb[4].mxu1 %vm285_vm2, %v271_v41  ;;  %v567_v45 = vld [vmem:[%s2941_s1 + $0x20] sm:$0xff]  ;;  %s2474_s1 = smov 64  }
 0x14b   :  { %v272_v48 = vmax.f32 %v258_v46, 0.0 }
 0x14d   :  { %2001 = vmatprep.mubr.msk.f32.mxu1 %vm285_vm2, %v272_v48 }
 0x14e   :  { %2002 = vmatmul.mubr.msk.f32.gmra.mrb[6].mxu1 %vm285_vm2, %v273_v47 }
 0x215   :  { %v1994_v57 = vpop.f32.mrb[0].mxu1 }
 0x216   :  { %v382_v58 = vadd.f32 %v1994_v57, %v1822_v56  ;;  %v376_v59 = vpop.f32.mrb[1].mxu1 }
 0x217   :  { %v377_v62 = vadd.f32 %v1822_v56, %v376_v59 }
 0x218   :  { %v416_v2 = vmax.f32 %v382_v58, 0.0 }
 0x219   :  { %v415_v63 = vmax.f32 %v377_v62, 0.0  ;;  %v1997_v0 = vpop.f32.mrb[2].mxu1 }
 0x21a   :  { %v392_v3 = vadd.f32 %v1997_v0, %v1822_v56  ;;  %v386_v4 = vpop.f32.mrb[3].mxu1 }
 0x21b   :  { %2012 = vmatprep.mubr.msk.f32.mxu0 %vm285_vm2, %v415_v63  ;;  %v387_v5 = vadd.f32 %v1822_v56, %v386_v4 }
 0x21c   :  { %2013 = vmatmul.mubr.msk.f32.vlgmr.msra.gmra.mrb[8].mxu0 %vm285_vm2, %v416_v2  ;;  %v418_v6 = vmax.f32 %v392_v3, 0.0 }
 0x21d   :  { %v417_v7 = vmax.f32 %v387_v5, 0.0  ;;  %v2000_v8 = vpop.f32.mrb[4].mxu1  ;;  %2184 = vmatpush3.bf16.msra.mxu0 %v2710_v1 }
 0x21e   :  { %v402_v9 = vadd.f32 %v2000_v8, %v1822_v56  ;;  %v396_v10 = vpop.f32.mrb[5].mxu1  ;;  %2185 = vmatprep.subr.bf16.mxu0 %v2471_v52 }
 0x21f   :  { %v397_v11 = vadd.f32 %v1822_v56, %v396_v10  ;;  %2015 = vmatprep.mubr.msk.f32.mxu0 %vm285_vm2, %v417_v7 }
 0x220   :  { %v420_v12 = vmax.f32 %v402_v9, 0.0  ;;  %2016 = vmatmul.mubr.msk.f32.gmra.mrb[10].mxu0 %vm285_vm2, %v418_v6 }
 0x221   :  { %v419_v13 = vmax.f32 %v397_v11, 0.0  ;;  %v2003_v14 = vpop.f32.mrb[6].mxu1  ;;  %2187 = vmatpush3.bf16.msra.mxu0 %v2728_v22 }
 0x222   :  { %v412_v15 = vadd.f32 %v2003_v14, %v1822_v56  ;;  %v406_v16 = vpop.f32.mrb[7].mxu1  ;;  %2194 = vmatprep.subr.bf16.mxu0 %v2471_v52 }
 0x223   :  { %v407_v17 = vadd.f32 %v1822_v56, %v406_v16  ;;  %2018 = vmatprep.mubr.msk.f32.mxu0 %vm285_vm2, %v419_v13 }
 0x224   :  { %v422_v18 = vmax.f32 %v412_v15, 0.0  ;;  %2019 = vmatmul.mubr.msk.f32.gmra.mrb[12].mxu0 %vm285_vm2, %v420_v12 }
 0x225   :  { %v421_v19 = vmax.f32 %v407_v17, 0.0 }
 0x227   :  { %2021 = vmatprep.mubr.msk.f32.mxu0 %vm285_vm2, %v421_v19 }
 0x228   :  { %2022 = vmatmul.mubr.msk.f32.gmra.mrb[14].mxu0 %vm285_vm2, %v422_v18 }
 0x229   :  { %2052 = vmatprep.mubr.msk.f32.mxu0 %vm2472_vm3, %v2473_v23 }
 0x22c   :  { %2053 = vmatmul.mubr.f32.vlgmr.msra.gmra.mrb[16].mxu0 %v2473_v23 }
 0x22d   :  { %2196 = vmatpush3.bf16.msra.mxu0 %v2710_v1  ;;  %2074 = vmatprep.mubr.msk.f32.mxu0 %vm2472_vm3, %v2473_v23 }
 0x22e   :  { %2197 = vmatprep.subr.bf16.mxu0 %v2471_v52 }
 0x231   :  { %2199 = vmatpush3.bf16.msra.mxu0 %v2728_v22 }
 0x232   :  { %2206 = vmatprep.subr.bf16.mxu0 %v2471_v52 }
 0x2ef   :  { %v2014_v25 = vpop.f32.mrb[8].mxu0 }
 0x2f0   :  { %v530_v26 = vadd.f32 %v2014_v25, %v1831_v24  ;;  %v524_v27 = vpop.f32.mrb[9].mxu0 }
 0x2f1   :  { %v525_v30 = vadd.f32 %v1831_v24, %v524_v27 }
 0x2f2   :  { %v572_v34 = vmul.f32 %v564_v29, %v530_v26 }
 0x2f3   :  { %v571_v31 = vmul.f32 %v563_v28, %v525_v30  ;;  %v2017_v32 = vpop.f32.mrb[10].mxu0  ;;  %v2795_v28 = vld [vmem:[#allocation2] sm:$0xff] }
 0x2f4   :  { %v540_v35 = vadd.f32 %v2017_v32, %v1831_v24  ;;  %v534_v36 = vpop.f32.mrb[11].mxu0  ;;  %vm822_vm4 = vcmp.gt.f32.partialorder %v2795_v28, 0.0  ;;  %vm935_vm5 = vcmp.gt.f32.partialorder %v2795_v28, 1.0  ;;  %vm1048_vm6 = vcmp.gt.f32.partialorder %v2795_v28, 2.0 }
 0x2f5   :  { %2032 = vmatprep.mubr.msk.f32.mxu1 %vm285_vm2, %v571_v31  ;;  %v535_v38 = vadd.f32 %v1831_v24, %v534_v36  ;;  %vm1161_vm7 = vcmp.gt.f32.partialorder %v2795_v28, 3.0  ;;  %vm1274_vm8 = vcmp.gt.f32.partialorder %v2795_v28, 4.0  ;;  %vm1387_vm9 = vcmp.gt.f32.partialorder %v2795_v28, 5.0 }
 0x2f6   :  { %2033 = vmatmul.mubr.msk.f32.vlgmr.msra.gmra.mrb[8].mxu1 %vm285_vm2, %v572_v34  ;;  %v574_v39 = vmul.f32 %v566_v33, %v540_v35  ;;  %vm1500_vm10 = vcmp.gt.f32.partialorder %v2795_v28, 6.0  ;;  %vm1613_vm11 = vcmp.gt.f32.partialorder %v2795_v28, 7.0 }
 0x2f7   :  { %v573_v40 = vmul.f32 %v565_v37, %v535_v38  ;;  %v2020_v41 = vpop.f32.mrb[12].mxu0  ;;  %2190 = vmatpush3.bf16.msra.mxu1 %v2710_v1 }
 0x2f8   :  { %v550_v43 = vadd.f32 %v2020_v41, %v1831_v24  ;;  %v544_v44 = vpop.f32.mrb[13].mxu0  ;;  %2191 = vmatprep.subr.bf16.mxu1 %v2471_v52 }
 0x2f9   :  { %v545_v46 = vadd.f32 %v1831_v24, %v544_v44  ;;  %2035 = vmatprep.mubr.msk.f32.mxu1 %vm285_vm2, %v573_v40 }
 0x2fa   :  { %v576_v47 = vmul.f32 %v568_v42, %v550_v43  ;;  %2036 = vmatmul.mubr.msk.f32.gmra.mrb[10].mxu1 %vm285_vm2, %v574_v39 }
 0x2fb   :  { %v575_v48 = vmul.f32 %v567_v45, %v545_v46  ;;  %v2023_v49 = vpop.f32.mrb[14].mxu0  ;;  %2193 = vmatpush3.bf16.msra.mxu1 %v2728_v22 }
 0x2fc   :  { %v560_v51 = vadd.f32 %v2023_v49, %v1831_v24  ;;  %v554_v53 = vpop.f32.mrb[15].mxu0  ;;  %2200 = vmatprep.subr.bf16.mxu1 %v2471_v52 }
 0x2fd   :  { %v555_v55 = vadd.f32 %v1831_v24, %v554_v53  ;;  %2038 = vmatprep.mubr.msk.f32.mxu1 %vm285_vm2, %v575_v48 }
 0x2fe   :  { %v578_v56 = vmul.f32 %v570_v50, %v560_v51  ;;  %2039 = vmatmul.mubr.msk.f32.gmra.mrb[12].mxu1 %vm285_vm2, %v576_v47 }
 0x2ff   :  { %v577_v57 = vmul.f32 %v569_v54, %v555_v55  ;;  %v793_v58 = vpop.f32.mrb[16].mxu0 }
 0x300   :  { %v2054_v59 = vpop.f32.mrb[17].mxu0 }
 0x301   :  { %2041 = vmatprep.mubr.msk.f32.mxu1 %vm285_vm2, %v577_v57 }
 0x302   :  { %2042 = vmatmul.mubr.msk.f32.gmra.mrb[14].mxu1 %vm285_vm2, %v578_v56 }
 0x303   :  { %2063 = vmatprep.mubr.msk.f32.mxu1 %vm2472_vm3, %v2473_v23 }
 0x3c9   :  { %v2034_v61 = vpop.f32.mrb[8].mxu1 }
 0x3ca   :  { %v686_v62 = vadd.f32 %v2034_v61, %v1840_v60  ;;  %v680_v63 = vpop.f32.mrb[9].mxu1 }
 0x3cb   :  { %v681_v0 = vadd.f32 %v1840_v60, %v680_v63 }
 0x3cd   :  { %v797_v2 = vadd.f32 %v793_v58, %v681_v0  ;;  %v2037_v3 = vpop.f32.mrb[10].mxu1 }
 0x3ce   :  { %v2779_v4 = vadd.f32 %v2037_v3, %v1840_v60  ;;  %v690_v5 = vpop.f32.mrb[11].mxu1 }
 0x3cf   :  { %2256 = vtanh.f32 %v797_v2  ;;  %v2781_v6 = vadd.f32 %v1840_v60, %v690_v5  ;;  %v1849_v16 = vmul.f32 -1.442695, %v797_v2 }
 0x3d1   :  { %v2040_v7 = vpop.f32.mrb[12].mxu1  ;;  %2258 = vpow2.f32 %v1849_v16 }
 0x3d2   :  { %v2783_v8 = vadd.f32 %v2040_v7, %v1840_v60  ;;  %v700_v9 = vpop.f32.mrb[13].mxu1 }
 0x3d3   :  { %v2785_v10 = vadd.f32 %v1840_v60, %v700_v9 }
 0x3d5   :  { %v2043_v11 = vpop.f32.mrb[14].mxu1 }
 0x3d6   :  { %v2787_v12 = vadd.f32 %v2043_v11, %v1840_v60  ;;  %v710_v13 = vpop.f32.mrb[15].mxu1 }
 0x3d7   :  { %v2789_v14 = vadd.f32 %v1840_v60, %v710_v13 }
 0x3d9   :  { %v2257_v15 = vpop.eup %2256 }
 0x3da   :  { %807 = vrot.lane.b32.xlu0 %v2257_v15, %s2474_s1 }
 0x3db   :  { %v2259_v17 = vpop.eup %2258 }
 0x3dc   :  { %v801_v18 = vadd.f32 1.0, %v2259_v17 }
 0x3de   :  { %2260 = vrcp.f32 %v801_v18 }
 0x3e8   :  { %v2261_v19 = vpop.eup %2260 }
 0x3e9   :  { %v805_v24 = vmul.f32 0.0, %v2261_v19 }
 0x44c   :  { %v808_v20 = vpop.permute.xlu0 %807 }
 0x44d   :  { %v810_v21 = vmul.f32 %v2261_v19, %v808_v20 }
 0x44f   :  { %812 = vrot.lane.b32.xlu0 %v810_v21, %s2475_s0 }
 0x4c1   :  { %v813_v25 = vpop.permute.xlu0 %812 }
 0x4c2   :  { %v815_v26 = vadd.f32 %v813_v25, %v805_v24 }
 0x4c4   :  { %2262 = vtanh.f32 %v815_v26  ;;  %829 = vrot.lane.b32.xlu0 %v815_v26, %s2476_s17 }
 0x4ce   :  { %v2263_v27 = vpop.eup %2262 }
 0x4cf   :  { %818 = vrot.lane.b32.xlu1 %v2263_v27, %s2474_s1 }
 0x536   :  { %v830_v29 = vpop.permute.xlu0 %829 }
 0x537   :  { %v832_v30 = vsel %vm822_vm4, %v830_v29, 0.0 }
 0x538   :  { %915 = vrot.lane.b32.xlu0 %v832_v30, %s2475_s0 }
 0x541   :  { %v819_v31 = vpop.permute.xlu1 %818 }
 0x542   :  { %v821_v32 = vmul.f32 %v2261_v19, %v819_v31 }
 0x544   :  { %824 = vrot.lane.b32.xlu1 %v821_v32, %s2475_s0 }
 0x5aa   :  { %v916_v45 = vpop.permute.xlu0 %915 }
 0x5b6   :  { %v825_v33 = vpop.permute.xlu1 %824 }
 0x5b7   :  { %v827_v34 = vsel %vm822_vm4, %v825_v33, 0.0 }
 0x5b8   :  { %2064 = vmatmul.mubr.msk.f32.vlgmr.msra.gmra.mrb[16].mxu1 %vm285_vm2, %v827_v34 }
 0x5b9   :  { %2202 = vmatpush3.bf16.msra.mxu1 %v2710_v1  ;;  %2085 = vmatprep.mubr.msk.f32.mxu1 %vm2472_vm3, %v2473_v23 }
 0x5ba   :  { %2203 = vmatprep.subr.bf16.mxu1 %v2471_v52 }
 0x5bd   :  { %2205 = vmatpush3.bf16.msra.mxu1 %v2728_v22 }
 0x5be   :  { %2212 = vmatprep.subr.bf16.mxu1 %v2471_v52 }
 0x68b   :  { %v902_v35 = vpop.f32.mrb[16].mxu1 }
 0x68c   :  { %v906_v36 = vadd.f32 %v902_v35, %v686_v62  ;;  %v2065_v37 = vpop.f32.mrb[17].mxu1 }
 0x68e   :  { %2264 = vtanh.f32 %v906_v36  ;;  %v1851_v39 = vmul.f32 -1.442695, %v906_v36 }
 0x690   :  { %2266 = vpow2.f32 %v1851_v39 }
 0x698   :  { %v2265_v38 = vpop.eup %2264 }
 0x699   :  { %920 = vrot.lane.b32.xlu1 %v2265_v38, %s2474_s1 }
 0x69a   :  { %v2267_v40 = vpop.eup %2266 }
 0x69b   :  { %v910_v41 = vadd.f32 1.0, %v2267_v40 }
 0x69d   :  { %2268 = vrcp.f32 %v910_v41 }
 0x6a7   :  { %v2269_v42 = vpop.eup %2268 }
 0x6a8   :  { %v918_v46 = vmul.f32 %v2269_v42, %v916_v45 }
 0x70b   :  { %v921_v43 = vpop.permute.xlu1 %920 }
 0x70c   :  { %v923_v44 = vmul.f32 %v2269_v42, %v921_v43 }
 0x70e   :  { %925 = vrot.lane.b32.xlu1 %v923_v44, %s2475_s0 }
 0x780   :  { %v926_v47 = vpop.permute.xlu1 %925 }
 0x781   :  { %v928_v48 = vadd.f32 %v926_v47, %v918_v46 }
 0x783   :  { %2270 = vtanh.f32 %v928_v48 }
 0x78d   :  { %v2271_v49 = vpop.eup %2270 }
 0x78e   :  { %931 = vrot.lane.b32.xlu0 %v2271_v49, %s2474_s1 }
 0x792   :  { %942 = vrot.lane.b32.xlu0 %v928_v48, %s2476_s17 }
 0x800   :  { %v932_v50 = vpop.permute.xlu0 %931 }
 0x801   :  { %v934_v51 = vmul.f32 %v2269_v42, %v932_v50 }
 0x803   :  { %937 = vrot.lane.b32.xlu1 %v934_v51, %s2475_s0 }
 0x804   :  { %v943_v53 = vpop.permute.xlu0 %942 }
 0x805   :  { %v945_v54 = vsel %vm935_vm5, %v943_v53, %v832_v30 }
 0x806   :  { %1028 = vrot.lane.b32.xlu0 %v945_v54, %s2475_s0 }
 0x875   :  { %v938_v55 = vpop.permute.xlu1 %937 }
 0x876   :  { %v940_v56 = vsel %vm935_vm5, %v938_v55, %v827_v34 }
 0x877   :  { %2075 = vmatmul.mubr.msk.f32.vlgmr.msra.gmra.mrb[18].mxu0 %vm285_vm2, %v940_v56 }
 0x878   :  { %2208 = vmatpush3.bf16.msra.mxu0 %v2710_v1  ;;  %2096 = vmatprep.mubr.msk.f32.mxu0 %vm2472_vm3, %v2473_v23  ;;  %v1029_v5 = vpop.permute.xlu0 %1028 }
 0x879   :  { %2209 = vmatprep.subr.bf16.mxu0 %v2471_v52 }
 0x87c   :  { %2211 = vmatpush3.bf16.msra.mxu0 %v2728_v22 }
 0x87d   :  { %2218 = vmatprep.subr.bf16.mxu0 %v2471_v52 }
 0x94a   :  { %v1015_v57 = vpop.f32.mrb[18].mxu0 }
 0x94b   :  { %v1019_v58 = vadd.f32 %v1015_v57, %v2781_v6  ;;  %v2076_v59 = vpop.f32.mrb[19].mxu0 }
 0x94d   :  { %2272 = vtanh.f32 %v1019_v58  ;;  %v1853_v61 = vmul.f32 -1.442695, %v1019_v58 }
 0x94f   :  { %2274 = vpow2.f32 %v1853_v61 }
 0x957   :  { %v2273_v60 = vpop.eup %2272 }
 0x958   :  { %1033 = vrot.lane.b32.xlu1 %v2273_v60, %s2474_s1 }
 0x959   :  { %v2275_v62 = vpop.eup %2274 }
 0x95a   :  { %v1023_v63 = vadd.f32 1.0, %v2275_v62 }
 0x95c   :  { %2276 = vrcp.f32 %v1023_v63 }
 0x966   :  { %v2277_v0 = vpop.eup %2276 }
 0x967   :  { %v1031_v7 = vmul.f32 %v2277_v0, %v1029_v5 }
 0x9ca   :  { %v1034_v2 = vpop.permute.xlu1 %1033 }
 0x9cb   :  { %v1036_v3 = vmul.f32 %v2277_v0, %v1034_v2 }
 0x9cd   :  { %1038 = vrot.lane.b32.xlu1 %v1036_v3, %s2475_s0 }
 0xa3f   :  { %v1039_v9 = vpop.permute.xlu1 %1038 }
 0xa40   :  { %v1041_v11 = vadd.f32 %v1039_v9, %v1031_v7 }
 0xa42   :  { %2278 = vtanh.f32 %v1041_v11 }
 0xa4c   :  { %v2279_v6 = vpop.eup %2278 }
 0xa4d   :  { %1044 = vrot.lane.b32.xlu0 %v2279_v6, %s2474_s1 }
 0xa51   :  { %1055 = vrot.lane.b32.xlu0 %v1041_v11, %s2476_s17 }
 0xabf   :  { %v1045_v13 = vpop.permute.xlu0 %1044 }
 0xac0   :  { %v1047_v15 = vmul.f32 %v2277_v0, %v1045_v13 }
 0xac2   :  { %1050 = vrot.lane.b32.xlu1 %v1047_v15, %s2475_s0 }
 0xac3   :  { %v1056_v16 = vpop.permute.xlu0 %1055 }
 0xac4   :  { %v1058_v17 = vsel %vm1048_vm6, %v1056_v16, %v945_v54 }
 0xac5   :  { %1141 = vrot.lane.b32.xlu0 %v1058_v17, %s2475_s0 }
 0xb34   :  { %v1051_v18 = vpop.permute.xlu1 %1050 }
 0xb35   :  { %v1053_v19 = vsel %vm1048_vm6, %v1051_v18, %v940_v56 }
 0xb36   :  { %2086 = vmatmul.mubr.msk.f32.vlgmr.msra.gmra.mrb[18].mxu1 %vm285_vm2, %v1053_v19 }
 0xb37   :  { %2214 = vmatpush3.bf16.msra.mxu1 %v2710_v1  ;;  %2107 = vmatprep.mubr.msk.f32.mxu1 %vm2472_vm3, %v2473_v23  ;;  %v1142_v33 = vpop.permute.xlu0 %1141 }
 0xb38   :  { %2215 = vmatprep.subr.bf16.mxu1 %v2471_v52 }
 0xb3b   :  { %2217 = vmatpush3.bf16.msra.mxu1 %v2728_v22 }
 0xb3c   :  { %2224 = vmatprep.subr.bf16.mxu1 %v2471_v52 }
 0xc09   :  { %v1128_v20 = vpop.f32.mrb[18].mxu1 }
 0xc0a   :  { %v1132_v21 = vadd.f32 %v1128_v20, %v2779_v4  ;;  %v2087_v24 = vpop.f32.mrb[19].mxu1 }
 0xc0c   :  { %2280 = vtanh.f32 %v1132_v21  ;;  %v1855_v26 = vmul.f32 -1.442695, %v1132_v21 }
 0xc0e   :  { %2282 = vpow2.f32 %v1855_v26 }
 0xc16   :  { %v2281_v25 = vpop.eup %2280 }
 0xc17   :  { %1146 = vrot.lane.b32.xlu1 %v2281_v25, %s2474_s1 }
 0xc18   :  { %v2283_v27 = vpop.eup %2282 }
 0xc19   :  { %v1136_v29 = vadd.f32 1.0, %v2283_v27 }
 0xc1b   :  { %2284 = vrcp.f32 %v1136_v29 }
 0xc25   :  { %v2285_v30 = vpop.eup %2284 }
 0xc26   :  { %v1144_v34 = vmul.f32 %v2285_v30, %v1142_v33 }
 0xc89   :  { %v1147_v31 = vpop.permute.xlu1 %1146 }
 0xc8a   :  { %v1149_v32 = vmul.f32 %v2285_v30, %v1147_v31 }
 0xc8c   :  { %1151 = vrot.lane.b32.xlu1 %v1149_v32, %s2475_s0 }
 0xcfe   :  { %v1152_v35 = vpop.permute.xlu1 %1151 }
 0xcff   :  { %v1154_v36 = vadd.f32 %v1152_v35, %v1144_v34 }
 0xd01   :  { %2286 = vtanh.f32 %v1154_v36 }
 0xd0b   :  { %v2287_v4 = vpop.eup %2286 }
 0xd0c   :  { %1157 = vrot.lane.b32.xlu0 %v2287_v4, %s2474_s1 }
 0xd10   :  { %1168 = vrot.lane.b32.xlu0 %v1154_v36, %s2476_s17 }
 0xd7e   :  { %v1158_v37 = vpop.permute.xlu0 %1157 }
 0xd7f   :  { %v1160_v38 = vmul.f32 %v2285_v30, %v1158_v37 }
 0xd81   :  { %1163 = vrot.lane.b32.xlu1 %v1160_v38, %s2475_s0 }
 0xd82   :  { %v1169_v39 = vpop.permute.xlu0 %1168 }
 0xd83   :  { %v1171_v40 = vsel %vm1161_vm7, %v1169_v39, %v1058_v17 }
 0xd84   :  { %1254 = vrot.lane.b32.xlu0 %v1171_v40, %s2475_s0 }
 0xdf3   :  { %v1164_v41 = vpop.permute.xlu1 %1163 }
 0xdf4   :  { %v1166_v42 = vsel %vm1161_vm7, %v1164_v41, %v1053_v19 }
 0xdf5   :  { %2097 = vmatmul.mubr.msk.f32.vlgmr.msra.gmra.mrb[20].mxu0 %vm285_vm2, %v1166_v42 }
 0xdf6   :  { %2220 = vmatpush3.bf16.msra.mxu0 %v2710_v1  ;;  %2118 = vmatprep.mubr.msk.f32.mxu0 %vm2472_vm3, %v2473_v23  ;;  %v1255_v54 = vpop.permute.xlu0 %1254 }
 0xdf7   :  { %2221 = vmatprep.subr.bf16.mxu0 %v2471_v52 }
 0xdfa   :  { %2223 = vmatpush3.bf16.msra.mxu0 %v2728_v22 }
 0xdfb   :  { %2230 = vmatprep.subr.bf16.mxu0 %v2471_v52 }
 0xec8   :  { %v1241_v43 = vpop.f32.mrb[20].mxu0 }
 0xec9   :  { %v1245_v44 = vadd.f32 %v1241_v43, %v2785_v10  ;;  %v2098_v45 = vpop.f32.mrb[21].mxu0 }
 0xecb   :  { %2288 = vtanh.f32 %v1245_v44  ;;  %v1857_v47 = vmul.f32 -1.442695, %v1245_v44 }
 0xecd   :  { %2290 = vpow2.f32 %v1857_v47 }
 0xed5   :  { %v2289_v46 = vpop.eup %2288 }
 0xed6   :  { %1259 = vrot.lane.b32.xlu1 %v2289_v46, %s2474_s1 }
 0xed7   :  { %v2291_v48 = vpop.eup %2290 }
 0xed8   :  { %v1249_v49 = vadd.f32 1.0, %v2291_v48 }
 0xeda   :  { %2292 = vrcp.f32 %v1249_v49 }
 0xee4   :  { %v2293_v50 = vpop.eup %2292 }
 0xee5   :  { %v1257_v55 = vmul.f32 %v2293_v50, %v1255_v54 }
 0xf48   :  { %v1260_v51 = vpop.permute.xlu1 %1259 }
 0xf49   :  { %v1262_v53 = vmul.f32 %v2293_v50, %v1260_v51 }
 0xf4b   :  { %1264 = vrot.lane.b32.xlu1 %v1262_v53, %s2475_s0 }
 0xfbd   :  { %v1265_v56 = vpop.permute.xlu1 %1264 }
 0xfbe   :  { %v1267_v57 = vadd.f32 %v1265_v56, %v1257_v55 }
 0xfc0   :  { %2294 = vtanh.f32 %v1267_v57 }
 0xfca   :  { %v2295_v10 = vpop.eup %2294 }
 0xfcb   :  { %1270 = vrot.lane.b32.xlu0 %v2295_v10, %s2474_s1 }
 0xfcf   :  { %1281 = vrot.lane.b32.xlu0 %v1267_v57, %s2476_s17 }
0x103d   :  { %v1271_v58 = vpop.permute.xlu0 %1270 }
0x103e   :  { %v1273_v59 = vmul.f32 %v2293_v50, %v1271_v58 }
0x1040   :  { %1276 = vrot.lane.b32.xlu1 %v1273_v59, %s2475_s0  ;;  %v1620_v59 = vld [vmem:[%s2952_s12 + $0x8] sm:$0xff] }
0x1041   :  { %v1282_v60 = vpop.permute.xlu0 %1281 }
0x1042   :  { %v1284_v61 = vsel %vm1274_vm8, %v1282_v60, %v1171_v40  ;;  %v1621_v60 = vld [vmem:[%s2952_s12 + $0x10] sm:$0xff] }
0x1043   :  { %1367 = vrot.lane.b32.xlu0 %v1284_v61, %s2475_s0 }
0x10b2   :  { %v1277_v62 = vpop.permute.xlu1 %1276 }
0x10b3   :  { %v1279_v63 = vsel %vm1274_vm8, %v1277_v62, %v1166_v42  ;;  %v1622_v62 = vld [vmem:[%s2952_s12 + $0x18] sm:$0xff] }
0x10b4   :  { %2108 = vmatmul.mubr.msk.f32.vlgmr.msra.gmra.mrb[20].mxu1 %vm285_vm2, %v1279_v63 }
0x10b5   :  { %2226 = vmatpush3.bf16.msra.mxu1 %v2710_v1  ;;  %2129 = vmatprep.mubr.msk.f32.mxu1 %vm2472_vm3, %v2473_v23 }
0x10b6   :  { %2227 = vmatprep.subr.bf16.mxu1 %v2471_v52 }
0x10b9   :  { %2229 = vmatpush3.bf16.msra.mxu1 %v2728_v22  ;;  %v1368_v22 = vpop.permute.xlu0 %1367 }
0x10ba   :  { %2236 = vmatprep.subr.bf16.mxu1 %v2471_v52 }
0x1187   :  { %v1354_v0 = vpop.f32.mrb[20].mxu1 }
0x1188   :  { %v1358_v2 = vadd.f32 %v1354_v0, %v2783_v8  ;;  %v2109_v3 = vpop.f32.mrb[21].mxu1 }
0x1189   :  { %v1705_v3 = vld [vmem:[%s2954_s14 + $0x8] sm:$0xff] }
0x118a   :  { %2296 = vtanh.f32 %v1358_v2  ;;  %v1859_v7 = vmul.f32 -1.442695, %v1358_v2  ;;  %v1704_v2 = vld [vmem:[%s2954_s14] sm:$0xff] }
0x118c   :  { %2298 = vpow2.f32 %v1859_v7 }
0x1194   :  { %v2297_v5 = vpop.eup %2296 }
0x1195   :  { %1372 = vrot.lane.b32.xlu1 %v2297_v5, %s2474_s1  ;;  %v2237_v5 = vpack.c.bf16 %v1705_v3, %v1704_v2 }
0x1196   :  { %v2299_v1 = vpop.eup %2298 }
0x1197   :  { %v1362_v9 = vadd.f32 1.0, %v2299_v1 }
0x1199   :  { %2300 = vrcp.f32 %v1362_v9 }
0x11a3   :  { %v2301_v11 = vpop.eup %2300 }
0x11a4   :  { %v1370_v15 = vmul.f32 %v2301_v11, %v1368_v22 }
0x1207   :  { %v1373_v6 = vpop.permute.xlu1 %1372 }
0x1208   :  { %v1375_v13 = vmul.f32 %v2301_v11, %v1373_v6  ;;  %v1706_v6 = vld [vmem:[%s2954_s14 + $0x10] sm:$0xff] }
0x120a   :  { %1377 = vrot.lane.b32.xlu1 %v1375_v13, %s2475_s0  ;;  %v1707_v13 = vld [vmem:[%s2954_s14 + $0x18] sm:$0xff]  ;;  %s2477_s14 = smov [#allocation11]  }
0x120b   :  { %v2240_v22 = vpack.c.bf16 %v1707_v13, %v1706_v6 }
0x127c   :  { %v1378_v16 = vpop.permute.xlu1 %1377 }
0x127d   :  { %v1380_v17 = vadd.f32 %v1378_v16, %v1370_v15 }
0x127f   :  { %2302 = vtanh.f32 %v1380_v17 }
0x1289   :  { %v2303_v8 = vpop.eup %2302 }
0x128a   :  { %1383 = vrot.lane.b32.xlu0 %v2303_v8, %s2474_s1  ;;  %v1866_v8 = vld [vmem:[%s2955_s15] ss:$0 sm:$0xff] }
0x128e   :  { %1394 = vrot.lane.b32.xlu0 %v1380_v17, %s2476_s17 }
0x12fc   :  { %v1384_v18 = vpop.permute.xlu0 %1383 }
0x12fd   :  { %v1386_v19 = vmul.f32 %v2301_v11, %v1384_v18 }
0x12ff   :  { %1389 = vrot.lane.b32.xlu1 %v1386_v19, %s2475_s0 }
0x1300   :  { %v1395_v20 = vpop.permute.xlu0 %1394 }
0x1301   :  { %v1397_v21 = vsel %vm1387_vm9, %v1395_v20, %v1284_v61 }
0x1302   :  { %1480 = vrot.lane.b32.xlu0 %v1397_v21, %s2475_s0 }
0x1371   :  { %v1390_v24 = vpop.permute.xlu1 %1389 }
0x1372   :  { %v1392_v25 = vsel %vm1387_vm9, %v1390_v24, %v1279_v63  ;;  %v2234_v63 = vpack.c.bf16 %v1622_v62, %v1621_v60 }
0x1373   :  { %2119 = vmatmul.mubr.msk.f32.vlgmr.msra.gmra.mrb[22].mxu0 %vm285_vm2, %v1392_v25 }
0x1374   :  { %2140 = vmatprep.mubr.msk.f32.mxu0 %vm2472_vm3, %v2473_v23  ;;  %v1481_v4 = vpop.permute.xlu0 %1480 }
0x1446   :  { %v1467_v26 = vpop.f32.mrb[22].mxu0 }
0x1447   :  { %v1471_v27 = vadd.f32 %v1467_v26, %v2789_v14  ;;  %v2120_v29 = vpop.f32.mrb[23].mxu0 }
0x1449   :  { %2304 = vtanh.f32 %v1471_v27  ;;  %v1861_v31 = vmul.f32 -1.442695, %v1471_v27 }
0x144b   :  { %2306 = vpow2.f32 %v1861_v31 }
0x1453   :  { %v2305_v30 = vpop.eup %2304 }
0x1454   :  { %1485 = vrot.lane.b32.xlu1 %v2305_v30, %s2474_s1 }
0x1455   :  { %v2307_v32 = vpop.eup %2306 }
0x1456   :  { %v1475_v33 = vadd.f32 1.0, %v2307_v32 }
0x1458   :  { %2308 = vrcp.f32 %v1475_v33 }
0x1462   :  { %v2309_v34 = vpop.eup %2308 }
0x1463   :  { %v1483_v37 = vmul.f32 %v2309_v34, %v1481_v4 }
0x14c6   :  { %v1486_v35 = vpop.permute.xlu1 %1485 }
0x14c7   :  { %v1488_v36 = vmul.f32 %v2309_v34, %v1486_v35 }
0x14c9   :  { %1490 = vrot.lane.b32.xlu1 %v1488_v36, %s2475_s0 }
0x153b   :  { %v1491_v38 = vpop.permute.xlu1 %1490 }
0x153c   :  { %v1493_v39 = vadd.f32 %v1491_v38, %v1483_v37 }
0x153e   :  { %2310 = vtanh.f32 %v1493_v39 }
0x1548   :  { %v2311_v14 = vpop.eup %2310 }
0x1549   :  { %1496 = vrot.lane.b32.xlu0 %v2311_v14, %s2474_s1 }
0x154d   :  { %1507 = vrot.lane.b32.xlu0 %v1493_v39, %s2476_s17 }
0x15bb   :  { %v1497_v40 = vpop.permute.xlu0 %1496 }
0x15bc   :  { %v1499_v41 = vmul.f32 %v2309_v34, %v1497_v40 }
0x15be   :  { %1502 = vrot.lane.b32.xlu1 %v1499_v41, %s2475_s0 }
0x15bf   :  { %v1508_v42 = vpop.permute.xlu0 %1507 }
0x15c0   :  { %v1510_v43 = vsel %vm1500_vm10, %v1508_v42, %v1397_v21 }
0x15c1   :  { %1593 = vrot.lane.b32.xlu0 %v1510_v43, %s2475_s0 }
0x1630   :  { %v1503_v44 = vpop.permute.xlu1 %1502 }
0x1631   :  { %v1505_v45 = vsel %vm1500_vm10, %v1503_v44, %v1392_v25 }
0x1632   :  { %2130 = vmatmul.mubr.msk.f32.vlgmr.msra.gmra.mrb[22].mxu1 %vm285_vm2, %v1505_v45 }
0x1633   :  { %2151 = vmatprep.mubr.msk.f32.mxu1 %vm2472_vm3, %v2473_v23  ;;  %v1594_v57 = vpop.permute.xlu0 %1593  ;;  %2238 = vmatpush3.bf16.msra.mxu1 %v2237_v5 }
0x1634   :  { %2239 = vmatprep.subr.bf16.mxu1 %v2471_v52 }
0x1637   :  { %2241 = vmatpush3.bf16.msra.mxu1 %v2240_v22 }
0x1705   :  { %v1580_v46 = vpop.f32.mrb[22].mxu1 }
0x1706   :  { %v1584_v47 = vadd.f32 %v1580_v46, %v2787_v12  ;;  %v2131_v48 = vpop.f32.mrb[23].mxu1  ;;  %v1619_v12 = vld [vmem:[%s2952_s12] sm:$0xff] }
0x1707   :  { %v2231_v61 = vpack.c.bf16 %v1620_v59, %v1619_v12 }
0x1708   :  { %2312 = vtanh.f32 %v1584_v47  ;;  %v1863_v50 = vmul.f32 -1.442695, %v1584_v47 }
0x1709   :  { %2232 = vmatpush3.bf16.msra.mxu0 %v2231_v61 }
0x170a   :  { %2314 = vpow2.f32 %v1863_v50  ;;  %2233 = vmatprep.subr.bf16.mxu0 %v2471_v52  ;;  %v1864_v52 = vld [vmem:[%s2953_s13] ss:$0 sm:$0xff]  ;;  %s1801_s13 = sshll.u32 %s2477_s14, 4  ;;  %s1802_s13 = int_to_ptr.vmem [resolvable:$true] %s1801_s13 }
0x170b   :  { %s2434_s7 = scalar_lea.vmem %s1802_s13, 128  ;;  %p2439_p13 = scmp.lt.s32.totalorder %s1802_s13, %s1802_s13 }
0x170c   :  { %p2435_p12 = scmp.ne.s32.totalorder %s1802_s13, %s2434_s7  ;;  %p2440_p0 = scmp.lt.s32.totalorder %s2434_s7, %s2434_s7 }
0x170d   :  { %2235 = vmatpush3.bf16.msra.mxu0 %v2234_v63 }
0x170e   :  { %p2441_p1 = por %p2440_p0, %p2439_p13 }
0x1710   :  { %p2442_p2 = pnand %p2441_p1, %p2435_p12 }
0x1712   :  { %v2313_v49 = vpop.eup %2312 }
0x1713   :  { %1598 = vrot.lane.b32.xlu1 %v2313_v49, %s2474_s1 }
0x1714   :  { %v2315_v51 = vpop.eup %2314 }
0x1715   :  { %v1588_v53 = vadd.f32 1.0, %v2315_v51 }
0x1717   :  { %2316 = vrcp.f32 %v1588_v53 }
0x1721   :  { %v2317_v54 = vpop.eup %2316 }
0x1722   :  { %v1596_v23 = vmul.f32 %v2317_v54, %v1594_v57 }
0x1785   :  { %v1599_v55 = vpop.permute.xlu1 %1598 }
0x1786   :  { %v1601_v56 = vmul.f32 %v2317_v54, %v1599_v55 }
0x1788   :  { %1603 = vrot.lane.b32.xlu1 %v1601_v56, %s2475_s0 }
0x17fa   :  { %v1604_v10 = vpop.permute.xlu1 %1603 }
0x17fb   :  { %v1606_v58 = vadd.f32 %v1604_v10, %v1596_v23 }
0x17fd   :  { %2318 = vtanh.f32 %v1606_v58 }
0x1807   :  { %v2319_v0 = vpop.eup %2318 }
0x1808   :  { %1609 = vrot.lane.b32.xlu0 %v2319_v0, %s2474_s1 }
0x187a   :  { %v1610_v7 = vpop.permute.xlu0 %1609 }
0x187b   :  { %v1612_v1 = vmul.f32 %v2317_v54, %v1610_v7 }
0x187d   :  { %1615 = vrot.lane.b32.xlu1 %v1612_v1, %s2475_s0 }
0x18ef   :  { %v1616_v9 = vpop.permute.xlu1 %1615 }
0x18f0   :  { %v1618_v11 = vsel %vm1613_vm11, %v1616_v9, %v1505_v45 }
0x18f1   :  { %2141 = vmatmul.mubr.msk.f32.vlgmr.msra.gmra.mrb[24].mxu0 %vm285_vm2, %v1618_v11 }
0x19c4   :  { %v1699_v15 = vpop.f32.mrb[24].mxu0 }
0x19c5   :  { %v1700_v28 = vadd.f32 %v1864_v52, %v1699_v15  ;;  %v2142_v16 = vpop.f32.mrb[25].mxu0 }
0x19c7   :  { %v1703_v17 = vmax.f32 %v1700_v28, 0.0 }
0x19c9   :  { %2152 = vmatmul.mubr.msk.f32.vlgmr.msra.gmra.mrb[24].mxu1 %vm285_vm2, %v1703_v17 }
0x1a9c   :  { %v1784_v18 = vpop.f32.mrb[24].mxu1 }
0x1a9d   :  { %v1785_v19 = vadd.f32 %v1866_v8, %v1784_v18  ;;  %v2153_v20 = vpop.f32.mrb[25].mxu1 }
0x1a9f   :  { %v1868_v21 = vmul.f32 -1.442695, %v1785_v19 }
0x1aa1   :  { %2320 = vpow2.f32 %v1868_v21 }
0x1aab   :  { %v2321_v24 = vpop.eup %2320 }
0x1aac   :  { %v1791_v25 = vadd.f32 1.0, %v2321_v24 }
0x1aae   :  { %2322 = vrcp.f32 %v1791_v25 }
0x1ab8   :  { %v2323_v26 = vpop.eup %2322 }
0x1ab9   :  { %1794 = vst [vmem:[#allocation11] sm:$0xff] %v2323_v26 }
0x1aba   :  { %2445 = shalt.err (!%p2442_p2)
}
0x1abb   :  { %s2962_s28 = sld [smem:[#allocation17_spill]] }
0x1ac1   :  { %s2446_s30 = scalar_lea.hbm %s2962_s28, 128 }
0x1ac2   :  { %p2447_p3 = scmp.ne.s32.totalorder %s2962_s28, %s2446_s30  ;;  %p2450_p4 = scmp.lt.u32.totalorder %s2446_s30, %s2962_s28 }
0x1ac4   :  { %p2452_p5 = pnand %p2450_p4, %p2447_p3 }
0x1ac6   :  { %2455 = shalt.err (!%p2452_p5)
}
0x1ac7   :  { %1804 = dma.vmem_to_hbm [thread:$0]  %s1802_s13, 128, %s2962_s28, [#allocation4]  }
0x1ac8   :  { %2462 = dma.done.wait [#allocation4], 128  }
0x1ac9   :  { %2463 = vsyncadd [#allocation4], 4294967168 }
0x1aca   :  { %1808 = vsyncpa [#allocation3], 1 }
0x1acb   :  { %1809 = vsyncpa [#allocation6], 1 }
0x1acc   :  { %1810 = vsyncpa [#allocation9], 1 }
0x1acd   :  { %1811 = vsyncpa [#allocation4], 1 }

</bundles_post_ra>
